<compile_context>
chip_gen: v5e
topology: v5e:2x2
jax: 0.10.0
libtpu: 0.0.40
codegen_flags: <defaults>
</compile_context>

<pallas_src>
import jax
import jax.numpy as jnp
from jax.experimental import pallas as pl
from jax.experimental.pallas import tpu as pltpu

_LANE = 128
_SUBLANE_BF16 = 16  # bf16 packs 2 rows/sublane -> native (16, 128) tile


def _round_up(x, m):
    return (x + m - 1) // m * m


def _fused_mlp_kernel(x_ref, *refs):
    """refs = (w1, b1, w2, b2, ..., wL, bL, o_ref).

    One batch tile of the whole MLP: each layer is an MXU matmul (bf16 in,
    f32 accumulate) + f32 bias/ReLU epilogue; intermediate activations never
    leave the core.
    """
    o_ref = refs[-1]
    wb_refs = refs[:-1]
    n_layers = len(wb_refs) // 2

    h = x_ref[...].astype(jnp.bfloat16)  # in-kernel cast; no extra HBM pass on x
    for li in range(n_layers):
        w_ref = wb_refs[2 * li]
        b_ref = wb_refs[2 * li + 1]
        y = jnp.dot(h, w_ref[...], preferred_element_type=jnp.float32)
        y = y + b_ref[...]  # (1, N) f32 bias broadcasts over the batch tile
        if li < n_layers - 1:
            y = jnp.maximum(y, 0.0)      # ReLU in f32 (VPU)
            # Dropout(p) is identity in eval mode -> nothing to do.
            h = y.astype(jnp.bfloat16)   # bf16 only for the next MXU matmul
        else:
            o_ref[...] = y.astype(o_ref.dtype)


def prepare_mlp_params(params):
    """One-time parameter prep (hoisted out of the per-call path).

    params: list of (W(in,out) f32, b(1,out) f32).
    Pads all feature dims to lane (128) multiples, casts weights to bf16,
    keeps biases in f32. Padded rows/cols are exactly zero, so valid outputs
    are untouched.
    """
    dims = [params[0][0].shape[0]] + [w.shape[1] for w, _ in params]
    pdims = [_round_up(d, _LANE) for d in dims]
    flat = []
    for li, (w, b) in enumerate(params):
        kin, kout = w.shape
        w_p = jnp.zeros((pdims[li], pdims[li + 1]), jnp.bfloat16)
        w_p = w_p.at[:kin, :kout].set(w.astype(jnp.bfloat16))
        b_p = jnp.zeros((1, pdims[li + 1]), jnp.float32)
        b_p = b_p.at[:, :kout].set(b.astype(jnp.float32).reshape(1, kout))
        flat += [w_p, b_p]
    return {"flat": tuple(flat), "dims": tuple(dims), "pdims": tuple(pdims)}


def mlp_forward(x, prepped, *, num_classes=None, block_m=256):
    """Eval-mode MLP forward as a single fused Pallas kernel.

    x: (M, input_dim) f32 (or bf16).  prepped: output of prepare_mlp_params().
    Returns (M, num_classes) f32.
    """
    M, K = x.shape
    dims, pdims, flat = prepped["dims"], prepped["pdims"], prepped["flat"]
    n_layers = len(flat) // 2
    if num_classes is None:
        num_classes = dims[-1]
    assert K == dims[0], f"input feature dim {K} != model input dim {dims[0]}"

    # Batch tile: multiple of 16 (bf16 native sublanes). Ensure >=2 grid tiles
    # when the batch is big enough so v7x's second TensorCore gets work.
    Mp = _round_up(M, _SUBLANE_BF16)
    tm = min(block_m, Mp)
    tm = _round_up(tm, _SUBLANE_BF16)
    if Mp // tm < 2 and tm > _SUBLANE_BF16:
        tm = _round_up((Mp + 1) // 2, _SUBLANE_BF16)
    Mp = _round_up(Mp, tm)

    # Pad x only when actually needed (input_dim like 768 / 12288 is already a
    # lane multiple, so in the common case x goes straight into the kernel).
    x_in = x
    if K != pdims[0] or Mp != M:
        x_in = jnp.pad(x, ((0, Mp - M), (0, pdims[0] - K)))

    n_out = pdims[-1]

    in_specs = [pl.BlockSpec((tm, pdims[0]), lambda i: (i, 0))]
    for li in range(n_layers):
        # Constant index_map -> VMEM-resident; single-buffered (no wasted 2nd buffer).
        in_specs.append(pl.BlockSpec((pdims[li], pdims[li + 1]), lambda i: (0, 0),
                                     pipeline_mode=pl.Buffered(1)))
        in_specs.append(pl.BlockSpec((1, pdims[li + 1]), lambda i: (0, 0),
                                     pipeline_mode=pl.Buffered(1)))
    out_spec = pl.BlockSpec((tm, n_out), lambda i: (i, 0))

    # VMEM budget: single-buffered resident params + double-buffered x/out tiles
    # + f32 intermediates + headroom.
    param_bytes = sum(int(a.size) * a.dtype.itemsize for a in flat)
    x_tile_bytes = tm * pdims[0] * x_in.dtype.itemsize
    out_tile_bytes = tm * n_out * 4
    act_bytes = tm * sum(pdims[1:]) * 4
    vmem_limit = param_bytes + 2 * (x_tile_bytes + out_tile_bytes) + act_bytes + (4 << 20)
    vmem_limit = int(max(min(vmem_limit, 100 << 20), 32 << 20))

    flops = 2 * Mp * sum(pdims[i] * pdims[i + 1] for i in range(n_layers))
    bytes_accessed = (Mp * pdims[0] * x_in.dtype.itemsize
                      + param_bytes
                      + Mp * n_out * 4)

    out = pl.pallas_call(
        _fused_mlp_kernel,
        out_shape=jax.ShapeDtypeStruct((Mp, n_out), jnp.float32),
        grid=(Mp // tm,),
        in_specs=in_specs,
        out_specs=out_spec,
        compiler_params=pltpu.CompilerParams(
            dimension_semantics=("parallel",),   # batch tiles: megacore-splittable on v7x
            vmem_limit_bytes=vmem_limit,
        ),
        cost_estimate=pl.CostEstimate(
            flops=flops, bytes_accessed=bytes_accessed, transcendentals=0),
    )(x_in, *flat)

    return out[:M, :num_classes]


def init_mlp_params(key, input_dim, hidden_layers, num_classes, dtype=jnp.float32):
    """Deterministic synthetic init mirroring nn.Linear shapes.

    PyTorch stores Linear weight as (out, in); we store (in, out).
    """
    dims = [input_dim] + list(hidden_layers) + [num_classes]
    params = []
    for i in range(len(dims) - 1):
        fan_in, fan_out = dims[i], dims[i + 1]
        key, kw, kb = jax.random.split(key, 3)
        bound = 1.0 / jnp.sqrt(jnp.asarray(fan_in, dtype))
        w = jax.random.uniform(kw, (fan_in, fan_out), dtype, -bound, bound)
        b = jax.random.uniform(kb, (1, fan_out), dtype, -bound, bound)
        params.append((w, b))
    return params


if __name__ == "__main__":
    # Small shapes consistent with the module: flattened image input, MLP head.
    batch = 4
    input_dim = 3 * 16 * 16          # 768 (scaled-down analogue of 64*64*3)
    hidden_layers = [512, 256, 128]
    num_classes = 3

    key = jax.random.PRNGKey(0)
    key, kx = jax.random.split(key)
    x = jax.random.normal(kx, (batch, input_dim), jnp.float32)

    params = init_mlp_params(key, input_dim, hidden_layers, num_classes)
    prepped = prepare_mlp_params(params)   # one-time prep, outside the hot path

    out = mlp_forward(x, prepped, num_classes=num_classes)
    out = jax.block_until_ready(out)

    # Reference in plain JAX with the same numerics (bf16 operands, f32 accumulate,
    # eval-mode dropout = identity).
    ref = x.astype(jnp.bfloat16)
    for li, (w, b) in enumerate(params):
        ref = jnp.dot(ref, w.astype(jnp.bfloat16),
                      preferred_element_type=jnp.float32) + b
        if li < len(params) - 1:
            ref = jnp.maximum(ref, 0.0).astype(jnp.bfloat16)

    assert out.shape == (batch, num_classes)
    assert jnp.allclose(out, ref, atol=2e-2, rtol=2e-2)

    print("KERNEL_OK")
</pallas_src>

<mosaic_0001>
module attributes {stable_mosaic.version = 11 : i64} {
  func.func @_fused_mlp_kernel(%arg0: i32, %arg1: memref<16x768xf32, #tpu.memory_space<vmem>>, %arg2: memref<768x512xbf16, #tpu.memory_space<vmem>>, %arg3: memref<1x512xf32, #tpu.memory_space<vmem>>, %arg4: memref<512x256xbf16, #tpu.memory_space<vmem>>, %arg5: memref<1x256xf32, #tpu.memory_space<vmem>>, %arg6: memref<256x128xbf16, #tpu.memory_space<vmem>>, %arg7: memref<1x128xf32, #tpu.memory_space<vmem>>, %arg8: memref<128x128xbf16, #tpu.memory_space<vmem>>, %arg9: memref<1x128xf32, #tpu.memory_space<vmem>>, %arg10: memref<16x128xf32, #tpu.memory_space<vmem>>) attributes {dimension_semantics = [#tpu.dimension_semantics<parallel>], iteration_bounds = array<i64: 1>, scalar_prefetch = 0 : i64, scratch_operands = 0 : i64, tpu.core_type = #tpu.core_type<tc>, window_params = [{transform_indices = @transform_0, window_bounds = array<i64: 16, 768>}, {pipeline_mode = #tpu.pipeline_mode<synchronous>, transform_indices = @transform_1, window_bounds = array<i64: 768, 512>}, {pipeline_mode = #tpu.pipeline_mode<synchronous>, transform_indices = @transform_2, window_bounds = array<i64: 1, 512>}, {pipeline_mode = #tpu.pipeline_mode<synchronous>, transform_indices = @transform_3, window_bounds = array<i64: 512, 256>}, {pipeline_mode = #tpu.pipeline_mode<synchronous>, transform_indices = @transform_4, window_bounds = array<i64: 1, 256>}, {pipeline_mode = #tpu.pipeline_mode<synchronous>, transform_indices = @transform_5, window_bounds = array<i64: 256, 128>}, {pipeline_mode = #tpu.pipeline_mode<synchronous>, transform_indices = @transform_6, window_bounds = array<i64: 1, 128>}, {pipeline_mode = #tpu.pipeline_mode<synchronous>, transform_indices = @transform_7, window_bounds = array<i64: 128, 128>}, {pipeline_mode = #tpu.pipeline_mode<synchronous>, transform_indices = @transform_8, window_bounds = array<i64: 1, 128>}, {transform_indices = @transform_9, window_bounds = array<i64: 16, 128>}]} {
    %c0 = arith.constant 0 : index
    %c0_0 = arith.constant 0 : index
    %0 = vector.load %arg1[%c0, %c0_0] : memref<16x768xf32, #tpu.memory_space<vmem>>, vector<16x768xf32>
    %1 = arith.truncf %0 : vector<16x768xf32> to vector<16x768xbf16>
    %c0_1 = arith.constant 0 : index
    %c0_2 = arith.constant 0 : index
    %2 = vector.load %arg2[%c0_1, %c0_2] : memref<768x512xbf16, #tpu.memory_space<vmem>>, vector<768x512xbf16>
    %cst = arith.constant dense<0.000000e+00> : vector<16x512xf32>
    %3 = tpu.matmul %1, %2, %cst {dimension_numbers = #tpu.dot_dimension_numbers<[1], [0], [0], [1], [0, 0, 1, 1], [], []>} : vector<16x768xbf16>, vector<768x512xbf16>, vector<16x512xf32> -> vector<16x512xf32>
    %c0_3 = arith.constant 0 : index
    %c0_4 = arith.constant 0 : index
    %4 = vector.load %arg3[%c0_3, %c0_4] : memref<1x512xf32, #tpu.memory_space<vmem>>, vector<1x512xf32>
    %5 = vector.broadcast %4 : vector<1x512xf32> to vector<16x512xf32>
    %6 = arith.addf %3, %5 : vector<16x512xf32>
    %cst_5 = arith.constant 0.000000e+00 : f32
    %7 = vector.broadcast %cst_5 : f32 to vector<16x512xf32>
    %8 = arith.maximumf %6, %7 : vector<16x512xf32>
    %9 = arith.truncf %8 : vector<16x512xf32> to vector<16x512xbf16>
    %c0_6 = arith.constant 0 : index
    %c0_7 = arith.constant 0 : index
    %10 = vector.load %arg4[%c0_6, %c0_7] : memref<512x256xbf16, #tpu.memory_space<vmem>>, vector<512x256xbf16>
    %cst_8 = arith.constant dense<0.000000e+00> : vector<16x256xf32>
    %11 = tpu.matmul %9, %10, %cst_8 {dimension_numbers = #tpu.dot_dimension_numbers<[1], [0], [0], [1], [0, 0, 1, 1], [], []>} : vector<16x512xbf16>, vector<512x256xbf16>, vector<16x256xf32> -> vector<16x256xf32>
    %c0_9 = arith.constant 0 : index
    %c0_10 = arith.constant 0 : index
    %12 = vector.load %arg5[%c0_9, %c0_10] : memref<1x256xf32, #tpu.memory_space<vmem>>, vector<1x256xf32>
    %13 = vector.broadcast %12 : vector<1x256xf32> to vector<16x256xf32>
    %14 = arith.addf %11, %13 : vector<16x256xf32>
    %cst_11 = arith.constant 0.000000e+00 : f32
    %15 = vector.broadcast %cst_11 : f32 to vector<16x256xf32>
    %16 = arith.maximumf %14, %15 : vector<16x256xf32>
    %17 = arith.truncf %16 : vector<16x256xf32> to vector<16x256xbf16>
    %c0_12 = arith.constant 0 : index
    %c0_13 = arith.constant 0 : index
    %18 = vector.load %arg6[%c0_12, %c0_13] : memref<256x128xbf16, #tpu.memory_space<vmem>>, vector<256x128xbf16>
    %cst_14 = arith.constant dense<0.000000e+00> : vector<16x128xf32>
    %19 = tpu.matmul %17, %18, %cst_14 {dimension_numbers = #tpu.dot_dimension_numbers<[1], [0], [0], [1], [0, 0, 1, 1], [], []>} : vector<16x256xbf16>, vector<256x128xbf16>, vector<16x128xf32> -> vector<16x128xf32>
    %c0_15 = arith.constant 0 : index
    %c0_16 = arith.constant 0 : index
    %20 = vector.load %arg7[%c0_15, %c0_16] : memref<1x128xf32, #tpu.memory_space<vmem>>, vector<1x128xf32>
    %21 = vector.broadcast %20 : vector<1x128xf32> to vector<16x128xf32>
    %22 = arith.addf %19, %21 : vector<16x128xf32>
    %cst_17 = arith.constant 0.000000e+00 : f32
    %23 = vector.broadcast %cst_17 : f32 to vector<16x128xf32>
    %24 = arith.maximumf %22, %23 : vector<16x128xf32>
    %25 = arith.truncf %24 : vector<16x128xf32> to vector<16x128xbf16>
    %c0_18 = arith.constant 0 : index
    %c0_19 = arith.constant 0 : index
    %26 = vector.load %arg8[%c0_18, %c0_19] : memref<128x128xbf16, #tpu.memory_space<vmem>>, vector<128x128xbf16>
    %cst_20 = arith.constant dense<0.000000e+00> : vector<16x128xf32>
    %27 = tpu.matmul %25, %26, %cst_20 {dimension_numbers = #tpu.dot_dimension_numbers<[1], [0], [0], [1], [0, 0, 1, 1], [], []>} : vector<16x128xbf16>, vector<128x128xbf16>, vector<16x128xf32> -> vector<16x128xf32>
    %c0_21 = arith.constant 0 : index
    %c0_22 = arith.constant 0 : index
    %28 = vector.load %arg9[%c0_21, %c0_22] : memref<1x128xf32, #tpu.memory_space<vmem>>, vector<1x128xf32>
    %29 = vector.broadcast %28 : vector<1x128xf32> to vector<16x128xf32>
    %30 = arith.addf %27, %29 : vector<16x128xf32>
    %c0_23 = arith.constant 0 : index
    %c0_24 = arith.constant 0 : index
    %31 = vector.load %arg10[%c0_23, %c0_24] : memref<16x128xf32, #tpu.memory_space<vmem>>, vector<16x128xf32>
    tpu.vector_store %arg10[%c0_23, %c0_24], %30 {strides = array<i32>} : memref<16x128xf32, #tpu.memory_space<vmem>>, vector<16x128xf32>,
    return
  }
  func.func @transform_0(%arg0: i32) -> (i32, i32) {
    %c0_i32 = arith.constant 0 : i32
    %c0_i32_0 = arith.constant 0 : i32
    return %arg0, %c0_i32 : i32, i32
  }
  func.func @transform_1(%arg0: i32) -> (i32, i32) {
    %c0_i32 = arith.constant 0 : i32
    %c0_i32_0 = arith.constant 0 : i32
    %c0_i32_1 = arith.constant 0 : i32
    return %c0_i32, %c0_i32_0 : i32, i32
  }
  func.func @transform_2(%arg0: i32) -> (i32, i32) {
    %c0_i32 = arith.constant 0 : i32
    %c0_i32_0 = arith.constant 0 : i32
    %c0_i32_1 = arith.constant 0 : i32
    return %c0_i32, %c0_i32_0 : i32, i32
  }
  func.func @transform_3(%arg0: i32) -> (i32, i32) {
    %c0_i32 = arith.constant 0 : i32
    %c0_i32_0 = arith.constant 0 : i32
    %c0_i32_1 = arith.constant 0 : i32
    return %c0_i32, %c0_i32_0 : i32, i32
  }
  func.func @transform_4(%arg0: i32) -> (i32, i32) {
    %c0_i32 = arith.constant 0 : i32
    %c0_i32_0 = arith.constant 0 : i32
    %c0_i32_1 = arith.constant 0 : i32
    return %c0_i32, %c0_i32_0 : i32, i32
  }
  func.func @transform_5(%arg0: i32) -> (i32, i32) {
    %c0_i32 = arith.constant 0 : i32
    %c0_i32_0 = arith.constant 0 : i32
    %c0_i32_1 = arith.constant 0 : i32
    return %c0_i32, %c0_i32_0 : i32, i32
  }
  func.func @transform_6(%arg0: i32) -> (i32, i32) {
    %c0_i32 = arith.constant 0 : i32
    %c0_i32_0 = arith.constant 0 : i32
    %c0_i32_1 = arith.constant 0 : i32
    return %c0_i32, %c0_i32_0 : i32, i32
  }
  func.func @transform_7(%arg0: i32) -> (i32, i32) {
    %c0_i32 = arith.constant 0 : i32
    %c0_i32_0 = arith.constant 0 : i32
    %c0_i32_1 = arith.constant 0 : i32
    return %c0_i32, %c0_i32_0 : i32, i32
  }
  func.func @transform_8(%arg0: i32) -> (i32, i32) {
    %c0_i32 = arith.constant 0 : i32
    %c0_i32_0 = arith.constant 0 : i32
    %c0_i32_1 = arith.constant 0 : i32
    return %c0_i32, %c0_i32_0 : i32, i32
  }
  func.func @transform_9(%arg0: i32) -> (i32, i32) {
    %c0_i32 = arith.constant 0 : i32
    %c0_i32_0 = arith.constant 0 : i32
    return %arg0, %c0_i32 : i32, i32
  }
}

</mosaic_0001>

<bundles_post_ra>
// kernel: tpu_custom_call.1
= control target key start
LH: loop header
LB: loop body
LE: loop exit
PB: predicated region body
PF: predicated region fallthrough
CT: control target
= control target key end

     0   :  { %14 = vsyncpa [#allocation3], 0  ;;  %s4175_s0 = inlined_call_operand.hbm [shape: f32[16,768], index: 0, kind: input, shape index: {}]   ;;  %s4176_s1 = inlined_call_operand.hbm [shape: bf16[768,512], index: 1, kind: input, shape index: {}]   ;;  %s4177_s2 = inlined_call_operand.hbm [shape: f32[1,512], index: 2, kind: input, shape index: {}]   ;;  %s4178_s3 = inlined_call_operand.hbm [shape: bf16[512,256], index: 3, kind: input, shape index: {}]   ;;  %s4179_s4 = inlined_call_operand.vmem [shape: f32[1,256], index: 4, kind: input, shape index: {}]   ;;  %s4180_s5 = inlined_call_operand.hbm [shape: bf16[256,128], index: 5, kind: input, shape index: {}]   ;;  %s4181_s6 = inlined_call_operand.vmem [shape: f32[1,128], index: 6, kind: input, shape index: {}]   ;;  %s4182_s7 = inlined_call_operand.hbm [shape: bf16[128,128], index: 7, kind: input, shape index: {}]   ;;  %s4183_s8 = inlined_call_operand.vmem [shape: f32[1,128], index: 8, kind: input, shape index: {}]   ;;  %s4184_s9 = inlined_call_operand.hbm [shape: f32[16,128], index: 9, kind: output, shape index: {}]  }
   0x1   :  { %15 = vsyncpa [#allocation6], 0 }
   0x2   :  { %16 = vsyncpa [#allocation9], 0 }
   0x3   :  { %17 = vsyncpa [#allocation12], 0  ;;  %s36_s11 = sshll.u32 %s4176_s1, 4  ;;  %s37_s11 = int_to_ptr.hbm [resolvable:$true] %s36_s11 }
   0x4   :  { %18 = vsyncpa [#allocation4], 0  ;;  %s4025_s12 = smov [#allocation5]   ;;  %s60_s16 = sshll.u32 %s4178_s3, 4  ;;  %s61_s16 = int_to_ptr.hbm [resolvable:$true] %s60_s16 }
   0x5   :  { %s38_s13 = sshll.u32 %s4025_s12, 4  ;;  %s4026_s17 = smov 256   ;;  %s39_s13 = int_to_ptr.vmem [resolvable:$true] %s38_s13 }
   0x6   :  { %s4027_s18 = smov 16   ;;  %s4028_s19 = smov [#allocation8]  }
   0x7   :  { %44 = dma.hbm_to_vmem [thread:$0]  %s37_s11, 24576, %s39_s13, [#allocation6], %s4026_s17, %s4026_s17, %s4027_s18  }
   0x8   :  { %s62_s20 = sshll.u32 %s4028_s19, 4  ;;  %s4029_s21 = smov 128   ;;  %s63_s20 = int_to_ptr.vmem [resolvable:$true] %s62_s20 }
   0x9   :  { %s4030_s22 = smov 8   ;;  %s23_s24 = sshll.u32 %s4175_s0, 4  ;;  %s24_s24 = int_to_ptr.hbm [resolvable:$true] %s23_s24 }
   0xa   :  { %68 = dma.hbm_to_vmem [thread:$0]  %s61_s16, 8192, %s63_s20, [#allocation9], %s4029_s21, %s4029_s21, %s4030_s22  }
   0xb   :  { %s4031_s25 = smov [#allocation2]   ;;  %s50_s28 = sshll.u32 %s4177_s2, 4  ;;  %s51_s28 = int_to_ptr.hbm [resolvable:$true] %s50_s28 }
   0xc   :  { %s25_s3 = sshll.u32 %s4031_s25, 4  ;;  %s4032_s29 = smov 768   ;;  %s26_s3 = int_to_ptr.vmem [resolvable:$true] %s25_s3 }
   0xd   :  { %s4033_s30 = smov 48   ;;  %s4034_s10 = smov [#allocation7]  }
   0xe   :  { %31 = dma.hbm_to_vmem [thread:$0]  %s24_s24, 1536, %s26_s3, [#allocation3], %s4032_s29, %s4032_s29, %s4033_s30  }
   0xf   :  { %s52_s11 = sshll.u32 %s4034_s10, 4  ;;  %s75_s14 = sshll.u32 %s4180_s5, 4  ;;  %s53_s11 = int_to_ptr.vmem [resolvable:$true] %s52_s11  ;;  %s76_s14 = int_to_ptr.hbm [resolvable:$true] %s75_s14 }
  0x10   :  { %55 = dma.hbm_to_vmem [thread:$0]  %s51_s28, 64, %s53_s11, [#allocation6]  }
  0x11   :  { %s4035_s0 = smov [#allocation10]   ;;  %s90_s2 = sshll.u32 %s4182_s7, 4  ;;  %s91_s2 = int_to_ptr.hbm [resolvable:$true] %s90_s2 }
  0x12   :  { %s77_s15 = sshll.u32 %s4035_s0, 4  ;;  %s4036_s18 = smov 64   ;;  %s78_s15 = int_to_ptr.vmem [resolvable:$true] %s77_s15 }
  0x13   :  { %s4037_s19 = smov 4   ;;  %s4038_s20 = smov [#allocation11]  }
  0x14   :  { %83 = dma.hbm_to_vmem [thread:$0]  %s76_s14, 2048, %s78_s15, [#allocation9], %s4036_s18, %s4036_s18, %s4037_s19  }
  0x15   :  { %s92_s1 = sshll.u32 %s4038_s20, 4  ;;  %s93_s1 = int_to_ptr.vmem [resolvable:$true] %s92_s1 }
  0x16   :  { %98 = dma.hbm_to_vmem [thread:$0]  %s91_s2, 1024, %s93_s1, [#allocation12], %s4036_s18, %s4036_s18, %s4037_s19  }
  0x17   :  { %4015 = dma.done.wait [#allocation3], 1536  }
  0x18   :  { %4016 = vsyncadd [#allocation3], 4294965760 }
  0x19   :  { %4017 = dma.done.wait [#allocation6], 24640  }
  0x1a   :  { %4018 = vsyncadd [#allocation6], 4294942656 }
  0x1b   :  { %4019 = dma.done.wait [#allocation9], 10240  }
  0x1c   :  { %4020 = vsyncadd [#allocation9], 4294957056 }
  0x1d   :  { %4021 = dma.done.wait [#allocation12], 1024  }
  0x1e   :  { %4022 = vsyncadd [#allocation12], 4294966272  ;;  %v2544_v0 = vld [vmem:[#allocation5 + $0xe0] sm:$0xf]  ;;  %v3580_v1 = vld [vmem:[#allocation5 + $0xec] sm:$0xf0] }
  0x1f   :  { %v2672_v2 = vld [vmem:[#allocation5 + $0x1e0] sm:$0xf]  ;;  %v2545_v3 = vor.u32 %v3580_v1, %v2544_v0  ;;  %v3612_v4 = vld [vmem:[#allocation5 + $0x1ec] sm:$0xf0]  ;;  %s4039_s3 = smov [#allocation13]   ;;  %s2414_s28 = sshll.u32 %s4184_s9, 4  ;;  %s2415_s28 = int_to_ptr.hbm [resolvable:$true] %s2414_s28 }
  0x20   :  { %v2800_v5 = vld [vmem:[#allocation5 + $0x2e0] sm:$0xf]  ;;  %v3644_v6 = vld [vmem:[#allocation5 + $0x2ec] sm:$0xf0]  ;;  %v2673_v7 = vor.u32 %v3612_v4, %v2672_v2  ;;  %s2412_s26 = sshll.u32 %s4039_s3, 4  ;;  %s2413_s26 = int_to_ptr.vmem [resolvable:$true] %s2412_s26 }
  0x21   :  { %v2801_v8 = vor.u32 %v3644_v6, %v2800_v5  ;;  %v2928_v9 = vld [vmem:[#allocation5 + $0x3e0] sm:$0xf]  ;;  %v3676_v10 = vld [vmem:[#allocation5 + $0x3ec] sm:$0xf0]  ;;  %1305 = vmatpush.bf16.msra.mxu0 %v2545_v3 }
  0x22   :  { %v2528_v11 = vld [vmem:[#allocation5 + $0xc0] sm:$0xf]  ;;  %v2929_v12 = vor.u32 %v3676_v10, %v2928_v9  ;;  %v3576_v13 = vld [vmem:[#allocation5 + $0xcc] sm:$0xf0]  ;;  %1319 = vmatpush.bf16.msra.mxu1 %v2673_v7 }
  0x23   :  { %v2656_v14 = vld [vmem:[#allocation5 + $0x1c0] sm:$0xf]  ;;  %v3608_v15 = vld [vmem:[#allocation5 + $0x1cc] sm:$0xf0]  ;;  %1333 = vmatpush.bf16.msra.mxu2 %v2801_v8  ;;  %v2529_v16 = vor.u32 %v3576_v13, %v2528_v11 }
  0x24   :  { %v2657_v17 = vor.u32 %v3608_v15, %v2656_v14  ;;  %v2784_v18 = vld [vmem:[#allocation5 + $0x2c0] sm:$0xf]  ;;  %v3640_v19 = vld [vmem:[#allocation5 + $0x2cc] sm:$0xf0]  ;;  %1347 = vmatpush.bf16.msra.mxu3 %v2929_v12 }
  0x25   :  { %v2912_v20 = vld [vmem:[#allocation5 + $0x3c0] sm:$0xf]  ;;  %v2785_v21 = vor.u32 %v3640_v19, %v2784_v18  ;;  %v3672_v22 = vld [vmem:[#allocation5 + $0x3cc] sm:$0xf0]  ;;  %1306 = vmatpush.bf16.msra.mxu0 %v2529_v16 }
  0x26   :  { %v2512_v23 = vld [vmem:[#allocation5 + $0xa0] sm:$0xf]  ;;  %v3572_v24 = vld [vmem:[#allocation5 + $0xac] sm:$0xf0]  ;;  %v2913_v25 = vor.u32 %v3672_v22, %v2912_v20  ;;  %1320 = vmatpush.bf16.msra.mxu1 %v2657_v17 }
  0x27   :  { %v2640_v26 = vld [vmem:[#allocation5 + $0x1a0] sm:$0xf]  ;;  %v3604_v27 = vld [vmem:[#allocation5 + $0x1ac] sm:$0xf0]  ;;  %v2513_v29 = vor.u32 %v3572_v24, %v2512_v23  ;;  %1334 = vmatpush.bf16.msra.mxu2 %v2785_v21 }
  0x28   :  { %v2768_v28 = vld [vmem:[#allocation5 + $0x2a0] sm:$0xf]  ;;  %v3636_v30 = vld [vmem:[#allocation5 + $0x2ac] sm:$0xf0]  ;;  %v2641_v33 = vor.u32 %v3604_v27, %v2640_v26  ;;  %1348 = vmatpush.bf16.msra.mxu3 %v2913_v25 }
  0x29   :  { %v2896_v31 = vld [vmem:[#allocation5 + $0x3a0] sm:$0xf]  ;;  %v3668_v32 = vld [vmem:[#allocation5 + $0x3ac] sm:$0xf0]  ;;  %v2769_v34 = vor.u32 %v3636_v30, %v2768_v28  ;;  %1307 = vmatpush.bf16.msra.mxu0 %v2513_v29 }
  0x2a   :  { %v2496_v35 = vld [vmem:[#allocation5 + $0x80] sm:$0xf]  ;;  %v3568_v36 = vld [vmem:[#allocation5 + $0x8c] sm:$0xf0]  ;;  %v2897_v38 = vor.u32 %v3668_v32, %v2896_v31  ;;  %1321 = vmatpush.bf16.msra.mxu1 %v2641_v33  ;;  %v3578_v33 = vld [vmem:[#allocation5 + $0xe4] sm:$0xf] }
  0x2b   :  { %v2624_v37 = vld [vmem:[#allocation5 + $0x180] sm:$0xf]  ;;  %v3600_v39 = vld [vmem:[#allocation5 + $0x18c] sm:$0xf0]  ;;  %v2497_v44 = vor.u32 %v3568_v36, %v2496_v35  ;;  %1335 = vmatpush.bf16.msra.mxu2 %v2769_v34  ;;  %v2546_v34 = vld [vmem:[#allocation5 + $0xf0] sm:$0xf0] }
  0x2c   :  { %v2752_v40 = vld [vmem:[#allocation5 + $0x280] sm:$0xf]  ;;  %v3632_v41 = vld [vmem:[#allocation5 + $0x28c] sm:$0xf0]  ;;  %v2625_v45 = vor.u32 %v3600_v39, %v2624_v37  ;;  %1349 = vmatpush.bf16.msra.mxu3 %v2897_v38  ;;  %v3610_v37 = vld [vmem:[#allocation5 + $0x1e4] sm:$0xf] }
  0x2d   :  { %v2880_v42 = vld [vmem:[#allocation5 + $0x380] sm:$0xf]  ;;  %v3664_v43 = vld [vmem:[#allocation5 + $0x38c] sm:$0xf0]  ;;  %v2753_v46 = vor.u32 %v3632_v41, %v2752_v40  ;;  %1308 = vmatpush.bf16.msra.mxu0 %v2497_v44  ;;  %v2674_v38 = vld [vmem:[#allocation5 + $0x1f0] sm:$0xf0] }
  0x2e   :  { %v2480_v47 = vld [vmem:[#allocation5 + $0x60] sm:$0xf]  ;;  %v3564_v48 = vld [vmem:[#allocation5 + $0x6c] sm:$0xf0]  ;;  %v2881_v50 = vor.u32 %v3664_v43, %v2880_v42  ;;  %1322 = vmatpush.bf16.msra.mxu1 %v2625_v45  ;;  %v2549_v43 = vor.u32 %v3578_v33, %v2546_v34  ;;  %v2482_v33 = vld [vmem:[#allocation5 + $0x70] sm:$0xf0] }
  0x2f   :  { %v2608_v49 = vld [vmem:[#allocation5 + $0x160] sm:$0xf]  ;;  %v3596_v51 = vld [vmem:[#allocation5 + $0x16c] sm:$0xf0]  ;;  %v2481_v56 = vor.u32 %v3564_v48, %v2480_v47  ;;  %1336 = vmatpush.bf16.msra.mxu2 %v2753_v46  ;;  %v2677_v47 = vor.u32 %v3610_v37, %v2674_v38  ;;  %v3574_v48 = vld [vmem:[#allocation5 + $0xc4] sm:$0xf] }
  0x30   :  { %v2736_v52 = vld [vmem:[#allocation5 + $0x260] sm:$0xf]  ;;  %v3628_v53 = vld [vmem:[#allocation5 + $0x26c] sm:$0xf0]  ;;  %v2609_v57 = vor.u32 %v3596_v51, %v2608_v49  ;;  %1350 = vmatpush.bf16.msra.mxu3 %v2881_v50  ;;  %v2530_v49 = vld [vmem:[#allocation5 + $0xd0] sm:$0xf0] }
  0x31   :  { %v2864_v54 = vld [vmem:[#allocation5 + $0x360] sm:$0xf]  ;;  %v3660_v55 = vld [vmem:[#allocation5 + $0x36c] sm:$0xf0]  ;;  %v2737_v58 = vor.u32 %v3628_v53, %v2736_v52  ;;  %1309 = vmatpush.bf16.msra.mxu0 %v2481_v56  ;;  %v3606_v50 = vld [vmem:[#allocation5 + $0x1c4] sm:$0xf] }
  0x32   :  { %v2464_v59 = vld [vmem:[#allocation5 + $0x40] sm:$0xf]  ;;  %v3560_v60 = vld [vmem:[#allocation5 + $0x4c] sm:$0xf0]  ;;  %v2865_v62 = vor.u32 %v3660_v55, %v2864_v54  ;;  %1323 = vmatpush.bf16.msra.mxu1 %v2609_v57  ;;  %v2658_v51 = vld [vmem:[#allocation5 + $0x1d0] sm:$0xf0] }
  0x33   :  { %v2592_v61 = vld [vmem:[#allocation5 + $0x140] sm:$0xf]  ;;  %v3592_v63 = vld [vmem:[#allocation5 + $0x14c] sm:$0xf0]  ;;  %v2465_v4 = vor.u32 %v3560_v60, %v2464_v59  ;;  %1337 = vmatpush.bf16.msra.mxu2 %v2737_v58  ;;  %v2533_v59 = vor.u32 %v3574_v48, %v2530_v49  ;;  %v3594_v34 = vld [vmem:[#allocation5 + $0x164] sm:$0xf] }
  0x34   :  { %v2720_v0 = vld [vmem:[#allocation5 + $0x240] sm:$0xf]  ;;  %v3624_v1 = vld [vmem:[#allocation5 + $0x24c] sm:$0xf0]  ;;  %v2593_v5 = vor.u32 %v3592_v63, %v2592_v61  ;;  %1351 = vmatpush.bf16.msra.mxu3 %v2865_v62  ;;  %v3570_v62 = vld [vmem:[#allocation5 + $0xa4] sm:$0xf]  ;;  %v2661_v63 = vor.u32 %v3606_v50, %v2658_v51 }
  0x35   :  { %v2848_v2 = vld [vmem:[#allocation5 + $0x340] sm:$0xf]  ;;  %v3656_v3 = vld [vmem:[#allocation5 + $0x34c] sm:$0xf0]  ;;  %v2721_v6 = vor.u32 %v3624_v1, %v2720_v0  ;;  %1310 = vmatpush.bf16.msra.mxu0 %v2465_v4  ;;  %v2514_v0 = vld [vmem:[#allocation5 + $0xb0] sm:$0xf0] }
  0x36   :  { %v2448_v7 = vld [vmem:[#allocation5 + $0x20] sm:$0xf]  ;;  %v3556_v8 = vld [vmem:[#allocation5 + $0x2c] sm:$0xf0]  ;;  %v2849_v10 = vor.u32 %v3656_v3, %v2848_v2  ;;  %1324 = vmatpush.bf16.msra.mxu1 %v2593_v5  ;;  %v126_v1 = vld [vmem:[#allocation2 + $0x8] sm:$0xff] }
  0x37   :  { %v2576_v9 = vld [vmem:[#allocation5 + $0x120] sm:$0xf]  ;;  %v3588_v11 = vld [vmem:[#allocation5 + $0x12c] sm:$0xf0]  ;;  %v2449_v16 = vor.u32 %v3556_v8, %v2448_v7  ;;  %1338 = vmatpush.bf16.msra.mxu2 %v2721_v6  ;;  %v132_v2 = vld [vmem:[#allocation2 + $0x38] sm:$0xff] }
  0x38   :  { %v2704_v12 = vld [vmem:[#allocation5 + $0x220] sm:$0xf]  ;;  %v3620_v13 = vld [vmem:[#allocation5 + $0x22c] sm:$0xf0]  ;;  %v2577_v19 = vor.u32 %v3588_v11, %v2576_v9  ;;  %1352 = vmatpush.bf16.msra.mxu3 %v2849_v10  ;;  %v3602_v3 = vld [vmem:[#allocation5 + $0x1a4] sm:$0xf]  ;;  %v4114_v6 = vpack.c.bf16 %v132_v2, %v126_v1 }
  0x39   :  { %v2832_v14 = vld [vmem:[#allocation5 + $0x320] sm:$0xf]  ;;  %v3652_v15 = vld [vmem:[#allocation5 + $0x32c] sm:$0xf0]  ;;  %v2705_v20 = vor.u32 %v3620_v13, %v2704_v12  ;;  %1311 = vmatpush.bf16.msra.mxu0 %v2449_v16  ;;  %v2642_v4 = vld [vmem:[#allocation5 + $0x1b0] sm:$0xf0]  ;;  %v2517_v12 = vor.u32 %v3570_v62, %v2514_v0 }
  0x3a   :  { %v2432_v17 = vld [vmem:[#allocation5] sm:$0xf]  ;;  %v3552_v18 = vld [vmem:[#allocation5 + $0xc] sm:$0xf0]  ;;  %v2833_v24 = vor.u32 %v3652_v15, %v2832_v14  ;;  %1325 = vmatpush.bf16.msra.mxu1 %v2577_v19  ;;  %v3566_v13 = vld [vmem:[#allocation5 + $0x84] sm:$0xf]  ;;  %v2645_v16 = vor.u32 %v3602_v3, %v2642_v4 }
  0x3b   :  { %v2560_v21 = vld [vmem:[#allocation5 + $0x100] sm:$0xf]  ;;  %v3584_v22 = vld [vmem:[#allocation5 + $0x10c] sm:$0xf0]  ;;  %v2433_v31 = vor.u32 %v3552_v18, %v2432_v17  ;;  %1339 = vmatpush.bf16.msra.mxu2 %v2705_v20  ;;  %v2498_v14 = vld [vmem:[#allocation5 + $0x90] sm:$0xf0] }
  0x3c   :  { %v2688_v23 = vld [vmem:[#allocation5 + $0x200] sm:$0xf]  ;;  %v3616_v25 = vld [vmem:[#allocation5 + $0x20c] sm:$0xf0]  ;;  %v2561_v35 = vor.u32 %v3584_v22, %v2560_v21  ;;  %1353 = vmatpush.bf16.msra.mxu3 %v2833_v24  ;;  %v128_v18 = vld [vmem:[#allocation2 + $0x18] sm:$0xff] }
  0x3d   :  { %v2816_v26 = vld [vmem:[#allocation5 + $0x300] sm:$0xf]  ;;  %v3648_v27 = vld [vmem:[#allocation5 + $0x30c] sm:$0xf0]  ;;  %v2689_v36 = vor.u32 %v3616_v25, %v2688_v23  ;;  %1312 = vmatpush.bf16.msra.mxu0 %v2433_v31  ;;  %v134_v19 = vld [vmem:[#allocation2 + $0x48] sm:$0xff] }
  0x3e   :  { %v3056_v28 = vld [vmem:[#allocation5 + $0x4e0] sm:$0xf]  ;;  %v3708_v29 = vld [vmem:[#allocation5 + $0x4ec] sm:$0xf0]  ;;  %v2817_v39 = vor.u32 %v3648_v27, %v2816_v26  ;;  %1326 = vmatpush.bf16.msra.mxu1 %v2561_v35  ;;  %v3598_v20 = vld [vmem:[#allocation5 + $0x184] sm:$0xf]  ;;  %v4119_v23 = vpack.c.bf16 %v134_v19, %v128_v18  ;;  %v2501_v26 = vor.u32 %v3566_v13, %v2498_v14 }
  0x3f   :  { %v3184_v30 = vld [vmem:[#allocation5 + $0x5e0] sm:$0xf]  ;;  %v3740_v32 = vld [vmem:[#allocation5 + $0x5ec] sm:$0xf0]  ;;  %v3057_v40 = vor.u32 %v3708_v29, %v3056_v28  ;;  %1340 = vmatpush.bf16.msra.mxu2 %v2689_v36  ;;  %v2626_v21 = vld [vmem:[#allocation5 + $0x190] sm:$0xf0] }
  0x40   :  { %v3040_v41 = vld [vmem:[#allocation5 + $0x4c0] sm:$0xf]  ;;  %v3185_v42 = vor.u32 %v3740_v32, %v3184_v30  ;;  %v3704_v44 = vld [vmem:[#allocation5 + $0x4cc] sm:$0xf0]  ;;  %1354 = vmatpush.bf16.msra.mxu3 %v2817_v39  ;;  %v2629_v30 = vor.u32 %v3598_v20, %v2626_v21  ;;  %v3562_v32 = vld [vmem:[#allocation5 + $0x64] sm:$0xf] }
  0x41   :  { %v3168_v45 = vld [vmem:[#allocation5 + $0x5c0] sm:$0xf]  ;;  %v3736_v46 = vld [vmem:[#allocation5 + $0x5cc] sm:$0xf0]  ;;  %1361 = vmatpush.bf16.msrb.mxu0 %v3057_v40  ;;  %v3041_v54 = vor.u32 %v3704_v44, %v3040_v41  ;;  %1327 = vmatmul.bf16.vlgmr.msra.gmra.mxu1 %v4114_v6  ;;  %v2610_v35 = vld [vmem:[#allocation5 + $0x170] sm:$0xf0]  ;;  %v2485_v38 = vor.u32 %v3562_v32, %v2482_v33 }
  0x42   :  { %v125_v52 = vld [vmem:[#allocation2] sm:$0xff]  ;;  %v131_v53 = vld [vmem:[#allocation2 + $0x30] sm:$0xff]  ;;  %1375 = vmatpush.bf16.msrb.mxu1 %v3185_v42  ;;  %v3169_v58 = vor.u32 %v3736_v46, %v3168_v45  ;;  %v2613_v42 = vor.u32 %v3594_v34, %v2610_v35 }
  0x43   :  { %v3024_v55 = vld [vmem:[#allocation5 + $0x4a0] sm:$0xf]  ;;  %v3700_v56 = vld [vmem:[#allocation5 + $0x4ac] sm:$0xf0]  ;;  %v4111_v57 = vpack.c.bf16 %v131_v53, %v125_v52  ;;  %1389 = vmatpush.bf16.msrb.mxu2 %v2549_v43  ;;  %1355 = vmatmul.bf16.vlgmr.msra.gmra.mxu3 %v4119_v23  ;;  %v3558_v44 = vld [vmem:[#allocation5 + $0x44] sm:$0xf] }
  0x44   :  { %v3152_v60 = vld [vmem:[#allocation5 + $0x5a0] sm:$0xf]  ;;  %v3732_v61 = vld [vmem:[#allocation5 + $0x5ac] sm:$0xf0]  ;;  %1403 = vmatpush.bf16.msrb.mxu3 %v2677_v47  ;;  %v3025_v7 = vor.u32 %v3700_v56, %v3024_v55  ;;  %v2466_v45 = vld [vmem:[#allocation5 + $0x50] sm:$0xf0] }
  0x45   :  { %1313 = vmatmul.bf16.vlgmr.msra.gmra.mxu0 %v4111_v57  ;;  %v3008_v5 = vld [vmem:[#allocation5 + $0x480] sm:$0xf]  ;;  %v3696_v8 = vld [vmem:[#allocation5 + $0x48c] sm:$0xf0]  ;;  %v3153_v11 = vor.u32 %v3732_v61, %v3152_v60  ;;  %v3590_v46 = vld [vmem:[#allocation5 + $0x144] sm:$0xf]  ;;  %v2469_v50 = vor.u32 %v3558_v44, %v2466_v45 }
  0x46   :  { %1362 = vmatpush.bf16.msrb.mxu0 %v3041_v54  ;;  %v3136_v9 = vld [vmem:[#allocation5 + $0x580] sm:$0xf]  ;;  %v3728_v10 = vld [vmem:[#allocation5 + $0x58c] sm:$0xf0]  ;;  %1376 = vmatpush.bf16.msrb.mxu1 %v3169_v58  ;;  %v3009_v24 = vor.u32 %v3696_v8, %v3008_v5  ;;  %v2594_v47 = vld [vmem:[#allocation5 + $0x150] sm:$0xf0] }
  0x47   :  { %1390 = vmatpush.bf16.msrb.mxu2 %v2533_v59  ;;  %v127_v15 = vld [vmem:[#allocation2 + $0x10] sm:$0xff]  ;;  %v133_v17 = vld [vmem:[#allocation2 + $0x40] sm:$0xff]  ;;  %v3137_v25 = vor.u32 %v3728_v10, %v3136_v9  ;;  %v2597_v54 = vor.u32 %v3590_v46, %v2594_v47 }
  0x48   :  { %1404 = vmatpush.bf16.msrb.mxu3 %v2661_v63  ;;  %v4117_v22 = vpack.c.bf16 %v133_v17, %v127_v15  ;;  %v2992_v27 = vld [vmem:[#allocation5 + $0x460] sm:$0xf]  ;;  %v3692_v28 = vld [vmem:[#allocation5 + $0x46c] sm:$0xf0]  ;;  %v3554_v56 = vld [vmem:[#allocation5 + $0x24] sm:$0xf] }
  0x49   :  { %v3120_v29 = vld [vmem:[#allocation5 + $0x560] sm:$0xf]  ;;  %v3724_v31 = vld [vmem:[#allocation5 + $0x56c] sm:$0xf0]  ;;  %v2993_v36 = vor.u32 %v3692_v28, %v2992_v27  ;;  %v2450_v58 = vld [vmem:[#allocation5 + $0x30] sm:$0xf0] }
  0x4a   :  { %1363 = vmatpush.bf16.msrb.mxu0 %v3025_v7  ;;  %1377 = vmatpush.bf16.msrb.mxu1 %v3153_v11  ;;  %v3121_v37 = vor.u32 %v3724_v31, %v3120_v29  ;;  %v2976_v39 = vld [vmem:[#allocation5 + $0x440] sm:$0xf]  ;;  %v3688_v40 = vld [vmem:[#allocation5 + $0x44c] sm:$0xf0]  ;;  %v3586_v59 = vld [vmem:[#allocation5 + $0x124] sm:$0xf]  ;;  %v2453_v2 = vor.u32 %v3554_v56, %v2450_v58 }
  0x4b   :  { %1391 = vmatpush.bf16.msrb.mxu2 %v2517_v12  ;;  %v3104_v41 = vld [vmem:[#allocation5 + $0x540] sm:$0xf]  ;;  %v3720_v43 = vld [vmem:[#allocation5 + $0x54c] sm:$0xf0]  ;;  %v2977_v48 = vor.u32 %v3688_v40, %v2976_v39  ;;  %v2578_v60 = vld [vmem:[#allocation5 + $0x130] sm:$0xf0] }
  0x4c   :  { %1405 = vmatpush.bf16.msrb.mxu3 %v2645_v16  ;;  %1341 = vmatmul.bf16.vlgmr.msra.gmra.mxu2 %v4117_v22  ;;  %v3105_v49 = vor.u32 %v3720_v43, %v3104_v41  ;;  %v2960_v51 = vld [vmem:[#allocation5 + $0x420] sm:$0xf]  ;;  %v3684_v52 = vld [vmem:[#allocation5 + $0x42c] sm:$0xf0]  ;;  %v3550_v4 = vld [vmem:[#allocation5 + $0x4] sm:$0xf]  ;;  %v2581_v7 = vor.u32 %v3586_v59, %v2578_v60 }
  0x4d   :  { %v3088_v53 = vld [vmem:[#allocation5 + $0x520] sm:$0xf]  ;;  %v3716_v55 = vld [vmem:[#allocation5 + $0x52c] sm:$0xf0]  ;;  %v2961_v61 = vor.u32 %v3684_v52, %v2960_v51  ;;  %v2434_v5 = vld [vmem:[#allocation5 + $0x10] sm:$0xf0] }
  0x4e   :  { %1364 = vmatpush.bf16.msrb.mxu0 %v3009_v24  ;;  %1378 = vmatpush.bf16.msrb.mxu1 %v3137_v25  ;;  %v2944_v62 = vld [vmem:[#allocation5 + $0x400] sm:$0xf]  ;;  %v3680_v63 = vld [vmem:[#allocation5 + $0x40c] sm:$0xf0]  ;;  %v3089_v1 = vor.u32 %v3716_v55, %v3088_v53  ;;  %v3582_v8 = vld [vmem:[#allocation5 + $0x104] sm:$0xf]  ;;  %v2437_v19 = vor.u32 %v3550_v4, %v2434_v5 }
  0x4f   :  { %1392 = vmatpush.bf16.msrb.mxu2 %v2501_v26  ;;  %v3072_v0 = vld [vmem:[#allocation5 + $0x500] sm:$0xf]  ;;  %v3712_v3 = vld [vmem:[#allocation5 + $0x50c] sm:$0xf0]  ;;  %v2562_v9 = vld [vmem:[#allocation5 + $0x110] sm:$0xf0]  ;;  %v2945_v14 = vor.u32 %v3680_v63, %v2944_v62 }
  0x50   :  { %1406 = vmatpush.bf16.msrb.mxu3 %v2629_v30  ;;  %v3642_v10 = vld [vmem:[#allocation5 + $0x2e4] sm:$0xf]  ;;  %v2802_v11 = vld [vmem:[#allocation5 + $0x2f0] sm:$0xf0]  ;;  %v3073_v18 = vor.u32 %v3712_v3, %v3072_v0  ;;  %v2565_v25 = vor.u32 %v3582_v8, %v2562_v9  ;;  %v130_v27 = vld [vmem:[#allocation2 + $0x28] sm:$0xff] }
  0x51   :  { %v3674_v12 = vld [vmem:[#allocation5 + $0x3e4] sm:$0xf]  ;;  %v2930_v13 = vld [vmem:[#allocation5 + $0x3f0] sm:$0xf0]  ;;  %v2805_v26 = vor.u32 %v3642_v10, %v2802_v11  ;;  %v136_v28 = vld [vmem:[#allocation2 + $0x58] sm:$0xff] }
  0x52   :  { %1365 = vmatpush.bf16.msrb.mxu0 %v2993_v36  ;;  %1379 = vmatpush.bf16.msrb.mxu1 %v3121_v37  ;;  %v3706_v15 = vld [vmem:[#allocation5 + $0x4e4] sm:$0xf]  ;;  %v3058_v16 = vld [vmem:[#allocation5 + $0x4f0] sm:$0xf0]  ;;  %v2933_v29 = vor.u32 %v3674_v12, %v2930_v13  ;;  %v4125_v39 = vpack.c.bf16 %v136_v28, %v130_v27 }
  0x53   :  { %1393 = vmatpush.bf16.msrb.mxu2 %v2485_v38  ;;  %v3738_v17 = vld [vmem:[#allocation5 + $0x5e4] sm:$0xf]  ;;  %v3186_v20 = vld [vmem:[#allocation5 + $0x5f0] sm:$0xf0]  ;;  %v3061_v30 = vor.u32 %v3706_v15, %v3058_v16 }
  0x54   :  { %1407 = vmatpush.bf16.msrb.mxu3 %v2613_v42  ;;  %v129_v21 = vld [vmem:[#allocation2 + $0x20] sm:$0xff]  ;;  %v135_v24 = vld [vmem:[#allocation2 + $0x50] sm:$0xff]  ;;  %v3189_v34 = vor.u32 %v3738_v17, %v3186_v20 }
  0x55   :  { %v3638_v31 = vld [vmem:[#allocation5 + $0x2c4] sm:$0xf]  ;;  %v2786_v32 = vld [vmem:[#allocation5 + $0x2d0] sm:$0xf0]  ;;  %v4123_v35 = vpack.c.bf16 %v135_v24, %v129_v21 }
  0x56   :  { %1366 = vmatpush.bf16.msrb.mxu0 %v2977_v48  ;;  %1380 = vmatpush.bf16.msrb.mxu1 %v3105_v49  ;;  %v3670_v33 = vld [vmem:[#allocation5 + $0x3c4] sm:$0xf]  ;;  %v2914_v36 = vld [vmem:[#allocation5 + $0x3d0] sm:$0xf0]  ;;  %v2789_v42 = vor.u32 %v3638_v31, %v2786_v32 }
  0x57   :  { %1394 = vmatpush.bf16.msrb.mxu2 %v2469_v50  ;;  %v3702_v37 = vld [vmem:[#allocation5 + $0x4c4] sm:$0xf]  ;;  %v3042_v38 = vld [vmem:[#allocation5 + $0x4d0] sm:$0xf0]  ;;  %v2917_v43 = vor.u32 %v3670_v33, %v2914_v36 }
  0x58   :  { %1408 = vmatpush.bf16.msrb.mxu3 %v2597_v54  ;;  %v3734_v40 = vld [vmem:[#allocation5 + $0x5c4] sm:$0xf]  ;;  %v3170_v41 = vld [vmem:[#allocation5 + $0x5d0] sm:$0xf0]  ;;  %v3045_v44 = vor.u32 %v3702_v37, %v3042_v38 }
  0x59   :  { %v3634_v45 = vld [vmem:[#allocation5 + $0x2a4] sm:$0xf]  ;;  %v2770_v46 = vld [vmem:[#allocation5 + $0x2b0] sm:$0xf0]  ;;  %v3173_v48 = vor.u32 %v3734_v40, %v3170_v41 }
  0x5a   :  { %1367 = vmatpush.bf16.msrb.mxu0 %v2961_v61  ;;  %1381 = vmatpush.bf16.msrb.mxu1 %v3089_v1  ;;  %v3666_v47 = vld [vmem:[#allocation5 + $0x3a4] sm:$0xf]  ;;  %v2898_v49 = vld [vmem:[#allocation5 + $0x3b0] sm:$0xf0]  ;;  %v2773_v54 = vor.u32 %v3634_v45, %v2770_v46 }
  0x5b   :  { %1395 = vmatpush.bf16.msrb.mxu2 %v2453_v2  ;;  %v3698_v50 = vld [vmem:[#allocation5 + $0x4a4] sm:$0xf]  ;;  %v3026_v51 = vld [vmem:[#allocation5 + $0x4b0] sm:$0xf0]  ;;  %v2901_v55 = vor.u32 %v3666_v47, %v2898_v49 }
  0x5c   :  { %1409 = vmatpush.bf16.msrb.mxu3 %v2581_v7  ;;  %v3730_v52 = vld [vmem:[#allocation5 + $0x5a4] sm:$0xf]  ;;  %v3154_v53 = vld [vmem:[#allocation5 + $0x5b0] sm:$0xf0]  ;;  %v3029_v56 = vor.u32 %v3698_v50, %v3026_v51 }
  0x5d   :  { %v3630_v58 = vld [vmem:[#allocation5 + $0x284] sm:$0xf]  ;;  %v2754_v59 = vld [vmem:[#allocation5 + $0x290] sm:$0xf0]  ;;  %v3157_v61 = vor.u32 %v3730_v52, %v3154_v53 }
  0x5e   :  { %1368 = vmatpush.bf16.msrb.mxu0 %v2945_v14  ;;  %1382 = vmatpush.bf16.msrb.mxu1 %v3073_v18  ;;  %v3662_v60 = vld [vmem:[#allocation5 + $0x384] sm:$0xf]  ;;  %v2882_v62 = vld [vmem:[#allocation5 + $0x390] sm:$0xf0]  ;;  %v2757_v3 = vor.u32 %v3630_v58, %v2754_v59  ;;  %v3581_v58 = vld [vmem:[#allocation5 + $0xf4] sm:$0xf0] }
  0x5f   :  { %1396 = vmatpush.bf16.msrb.mxu2 %v2437_v19  ;;  %v3694_v63 = vld [vmem:[#allocation5 + $0x484] sm:$0xf]  ;;  %v3010_v0 = vld [vmem:[#allocation5 + $0x490] sm:$0xf0]  ;;  %v2885_v4 = vor.u32 %v3662_v60, %v2882_v62  ;;  %v2680_v59 = vld [vmem:[#allocation5 + $0x1e8] sm:$0xf] }
  0x60   :  { %1410 = vmatpush.bf16.msrb.mxu3 %v2565_v25  ;;  %v3726_v1 = vld [vmem:[#allocation5 + $0x584] sm:$0xf]  ;;  %v3138_v2 = vld [vmem:[#allocation5 + $0x590] sm:$0xf0]  ;;  %v3013_v5 = vor.u32 %v3694_v63, %v3010_v0  ;;  %v3613_v60 = vld [vmem:[#allocation5 + $0x1f4] sm:$0xf0] }
  0x61   :  { %1369 = vmatmul.bf16.vlgmr.msrb.gmra.mxu0 %v4123_v35  ;;  %1383 = vmatmul.bf16.vlgmr.msrb.gmra.mxu1 %v4125_v39  ;;  %v3626_v7 = vld [vmem:[#allocation5 + $0x264] sm:$0xf]  ;;  %v2738_v8 = vld [vmem:[#allocation5 + $0x270] sm:$0xf0]  ;;  %v3141_v10 = vor.u32 %v3726_v1, %v3138_v2  ;;  %v2808_v62 = vld [vmem:[#allocation5 + $0x2e8] sm:$0xf] }
  0x62   :  { %1417 = vmatpush.bf16.msra.mxu0 %v2805_v26  ;;  %1431 = vmatpush.bf16.msra.mxu1 %v2933_v29  ;;  %v3658_v9 = vld [vmem:[#allocation5 + $0x364] sm:$0xf]  ;;  %v2866_v11 = vld [vmem:[#allocation5 + $0x370] sm:$0xf0]  ;;  %v2741_v16 = vor.u32 %v3626_v7, %v2738_v8  ;;  %v3645_v63 = vld [vmem:[#allocation5 + $0x2f4] sm:$0xf0]  ;;  %v2681_v7 = vor.u32 %v3613_v60, %v2680_v59 }
  0x63   :  { %1445 = vmatpush.bf16.msra.mxu2 %v3061_v30  ;;  %1411 = vmatmul.bf16.vlgmr.msrb.gmra.mxu3 %v4114_v6  ;;  %v3690_v12 = vld [vmem:[#allocation5 + $0x464] sm:$0xf]  ;;  %v2994_v13 = vld [vmem:[#allocation5 + $0x470] sm:$0xf0]  ;;  %v2869_v17 = vor.u32 %v3658_v9, %v2866_v11  ;;  %v2936_v2 = vld [vmem:[#allocation5 + $0x3e8] sm:$0xf]  ;;  %v2809_v8 = vor.u32 %v3645_v63, %v2808_v62 }
  0x64   :  { %1459 = vmatpush.bf16.msra.mxu3 %v3189_v34  ;;  %1397 = vmatmul.bf16.vlgmr.msrb.gmra.mxu2 %v4111_v57  ;;  %v3722_v14 = vld [vmem:[#allocation5 + $0x564] sm:$0xf]  ;;  %v3122_v15 = vld [vmem:[#allocation5 + $0x570] sm:$0xf0]  ;;  %v2997_v18 = vor.u32 %v3690_v12, %v2994_v13  ;;  %v2536_v9 = vld [vmem:[#allocation5 + $0xc8] sm:$0xf] }
  0x65   :  { %v3622_v19 = vld [vmem:[#allocation5 + $0x244] sm:$0xf]  ;;  %v2722_v20 = vld [vmem:[#allocation5 + $0x250] sm:$0xf0]  ;;  %v3125_v24 = vor.u32 %v3722_v14, %v3122_v15  ;;  %v2664_v11 = vld [vmem:[#allocation5 + $0x1c8] sm:$0xf] }
  0x66   :  { %1418 = vmatpush.bf16.msra.mxu0 %v2789_v42  ;;  %1432 = vmatpush.bf16.msra.mxu1 %v2917_v43  ;;  %v3654_v21 = vld [vmem:[#allocation5 + $0x344] sm:$0xf]  ;;  %v2850_v25 = vld [vmem:[#allocation5 + $0x350] sm:$0xf0]  ;;  %v2725_v30 = vor.u32 %v3622_v19, %v2722_v20  ;;  %v3609_v13 = vld [vmem:[#allocation5 + $0x1d4] sm:$0xf0] }
  0x67   :  { %1446 = vmatpush.bf16.msra.mxu2 %v3045_v44  ;;  %v3686_v26 = vld [vmem:[#allocation5 + $0x444] sm:$0xf]  ;;  %v2978_v27 = vld [vmem:[#allocation5 + $0x450] sm:$0xf0]  ;;  %v2853_v31 = vor.u32 %v3654_v21, %v2850_v25  ;;  %v2792_v14 = vld [vmem:[#allocation5 + $0x2c8] sm:$0xf]  ;;  %v2665_v19 = vor.u32 %v3609_v13, %v2664_v11 }
  0x68   :  { %1460 = vmatpush.bf16.msra.mxu3 %v3173_v48  ;;  %v3718_v28 = vld [vmem:[#allocation5 + $0x544] sm:$0xf]  ;;  %v3106_v29 = vld [vmem:[#allocation5 + $0x550] sm:$0xf0]  ;;  %v2981_v32 = vor.u32 %v3686_v26, %v2978_v27  ;;  %v3641_v15 = vld [vmem:[#allocation5 + $0x2d4] sm:$0xf0] }
  0x69   :  { %v3618_v33 = vld [vmem:[#allocation5 + $0x224] sm:$0xf]  ;;  %v2706_v34 = vld [vmem:[#allocation5 + $0x230] sm:$0xf0]  ;;  %v3109_v37 = vor.u32 %v3718_v28, %v3106_v29  ;;  %v2793_v20 = vor.u32 %v3641_v15, %v2792_v14  ;;  %v2520_v21 = vld [vmem:[#allocation5 + $0xa8] sm:$0xf] }
  0x6a   :  { %1419 = vmatpush.bf16.msra.mxu0 %v2773_v54  ;;  %1433 = vmatpush.bf16.msra.mxu1 %v2901_v55  ;;  %v3650_v36 = vld [vmem:[#allocation5 + $0x324] sm:$0xf]  ;;  %v2834_v38 = vld [vmem:[#allocation5 + $0x330] sm:$0xf0]  ;;  %v2709_v45 = vor.u32 %v3618_v33, %v2706_v34  ;;  %v2648_v25 = vld [vmem:[#allocation5 + $0x1a8] sm:$0xf] }
  0x6b   :  { %1447 = vmatpush.bf16.msra.mxu2 %v3029_v56  ;;  %v3682_v40 = vld [vmem:[#allocation5 + $0x424] sm:$0xf]  ;;  %v2962_v41 = vld [vmem:[#allocation5 + $0x430] sm:$0xf0]  ;;  %v2837_v49 = vor.u32 %v3650_v36, %v2834_v38  ;;  %v2552_v56 = vld [vmem:[#allocation5 + $0xe8] sm:$0xf] }
  0x6c   :  { %1461 = vmatpush.bf16.msra.mxu3 %v3157_v61  ;;  %v3714_v42 = vld [vmem:[#allocation5 + $0x524] sm:$0xf]  ;;  %v3090_v43 = vld [vmem:[#allocation5 + $0x530] sm:$0xf0]  ;;  %v2965_v50 = vor.u32 %v3682_v40, %v2962_v41  ;;  %v3605_v27 = vld [vmem:[#allocation5 + $0x1b4] sm:$0xf0] }
  0x6d   :  { %v3614_v44 = vld [vmem:[#allocation5 + $0x204] sm:$0xf]  ;;  %v2690_v46 = vld [vmem:[#allocation5 + $0x210] sm:$0xf0]  ;;  %v3093_v54 = vor.u32 %v3714_v42, %v3090_v43  ;;  %v2776_v28 = vld [vmem:[#allocation5 + $0x2a8] sm:$0xf]  ;;  %v2649_v33 = vor.u32 %v3605_v27, %v2648_v25 }
  0x6e   :  { %1420 = vmatpush.bf16.msra.mxu0 %v2757_v3  ;;  %1434 = vmatpush.bf16.msra.mxu1 %v2885_v4  ;;  %v3646_v47 = vld [vmem:[#allocation5 + $0x304] sm:$0xf]  ;;  %v2818_v48 = vld [vmem:[#allocation5 + $0x310] sm:$0xf0]  ;;  %v2693_v61 = vor.u32 %v3614_v44, %v2690_v46  ;;  %v3677_v3 = vld [vmem:[#allocation5 + $0x3f4] sm:$0xf0] }
  0x6f   :  { %1448 = vmatpush.bf16.msra.mxu2 %v3013_v5  ;;  %v3678_v51 = vld [vmem:[#allocation5 + $0x404] sm:$0xf]  ;;  %v2946_v52 = vld [vmem:[#allocation5 + $0x410] sm:$0xf0]  ;;  %v2821_v0 = vor.u32 %v3646_v47, %v2818_v48  ;;  %v2553_v5 = vor.u32 %v3581_v58, %v2552_v56  ;;  %v2937_v12 = vor.u32 %v3677_v3, %v2936_v2  ;;  %v3637_v29 = vld [vmem:[#allocation5 + $0x2b4] sm:$0xf0] }
  0x70   :  { %1462 = vmatpush.bf16.msra.mxu3 %v3141_v10  ;;  %v3710_v53 = vld [vmem:[#allocation5 + $0x504] sm:$0xf]  ;;  %v3074_v55 = vld [vmem:[#allocation5 + $0x510] sm:$0xf0]  ;;  %v2949_v1 = vor.u32 %v3678_v51, %v2946_v52  ;;  %v3577_v10 = vld [vmem:[#allocation5 + $0xd4] sm:$0xf0]  ;;  %v2777_v34 = vor.u32 %v3637_v29, %v2776_v28 }
  0x71   :  { %v3077_v4 = vor.u32 %v3710_v53, %v3074_v55  ;;  %v2504_v36 = vld [vmem:[#allocation5 + $0x88] sm:$0xf]  ;;  %v3601_v41 = vld [vmem:[#allocation5 + $0x194] sm:$0xf0] }
  0x72   :  { %1421 = vmatpush.bf16.msra.mxu0 %v2741_v16  ;;  %1435 = vmatpush.bf16.msra.mxu1 %v2869_v17  ;;  %v2920_v16 = vld [vmem:[#allocation5 + $0x3c8] sm:$0xf]  ;;  %v3673_v17 = vld [vmem:[#allocation5 + $0x3d4] sm:$0xf0] }
  0x73   :  { %1449 = vmatpush.bf16.msra.mxu2 %v2997_v18  ;;  %v2537_v18 = vor.u32 %v3577_v10, %v2536_v9  ;;  %v2921_v26 = vor.u32 %v3673_v17, %v2920_v16  ;;  %v2632_v38 = vld [vmem:[#allocation5 + $0x188] sm:$0xf]  ;;  %v3633_v43 = vld [vmem:[#allocation5 + $0x294] sm:$0xf0] }
  0x74   :  { %1463 = vmatpush.bf16.msra.mxu3 %v3125_v24  ;;  %v3573_v24 = vld [vmem:[#allocation5 + $0xb4] sm:$0xf0]  ;;  %v2760_v42 = vld [vmem:[#allocation5 + $0x288] sm:$0xf]  ;;  %v2633_v47 = vor.u32 %v3601_v41, %v2632_v38  ;;  %v3579_v41 = vld [vmem:[#allocation5 + $0xec] sm:$0xf] }
  0x75   :  { %v2888_v44 = vld [vmem:[#allocation5 + $0x388] sm:$0xf]  ;;  %v2761_v48 = vor.u32 %v3633_v43, %v2760_v42  ;;  %v3597_v53 = vld [vmem:[#allocation5 + $0x174] sm:$0xf0]  ;;  %v2554_v42 = vld [vmem:[#allocation5 + $0xf8] sm:$0xf0] }
  0x76   :  { %1422 = vmatpush.bf16.msra.mxu0 %v2725_v30  ;;  %1436 = vmatpush.bf16.msra.mxu1 %v2853_v31  ;;  %v2904_v30 = vld [vmem:[#allocation5 + $0x3a8] sm:$0xf]  ;;  %v3669_v31 = vld [vmem:[#allocation5 + $0x3b4] sm:$0xf0] }
  0x77   :  { %1450 = vmatpush.bf16.msra.mxu2 %v2981_v32  ;;  %v2521_v32 = vor.u32 %v3573_v24, %v2520_v21  ;;  %v2905_v40 = vor.u32 %v3669_v31, %v2904_v30  ;;  %v2616_v51 = vld [vmem:[#allocation5 + $0x168] sm:$0xf]  ;;  %v3629_v55 = vld [vmem:[#allocation5 + $0x274] sm:$0xf0] }
  0x78   :  { %1464 = vmatpush.bf16.msra.mxu3 %v3109_v37  ;;  %v3569_v37 = vld [vmem:[#allocation5 + $0x94] sm:$0xf0]  ;;  %v2872_v56 = vld [vmem:[#allocation5 + $0x368] sm:$0xf]  ;;  %v2617_v60 = vor.u32 %v3597_v53, %v2616_v51 }
  0x79   :  { %v2505_v46 = vor.u32 %v3569_v37, %v2504_v36  ;;  %v3661_v58 = vld [vmem:[#allocation5 + $0x374] sm:$0xf0]  ;;  %v2472_v62 = vld [vmem:[#allocation5 + $0x48] sm:$0xf] }
  0x7a   :  { %1423 = vmatpush.bf16.msra.mxu0 %v2709_v45  ;;  %1437 = vmatpush.bf16.msra.mxu1 %v2837_v49  ;;  %v3665_v45 = vld [vmem:[#allocation5 + $0x394] sm:$0xf0]  ;;  %v2488_v49 = vld [vmem:[#allocation5 + $0x68] sm:$0xf] }
  0x7b   :  { %1451 = vmatpush.bf16.msra.mxu2 %v2965_v50  ;;  %v3565_v50 = vld [vmem:[#allocation5 + $0x74] sm:$0xf0]  ;;  %v2889_v52 = vor.u32 %v3665_v45, %v2888_v44  ;;  %v2728_v3 = vld [vmem:[#allocation5 + $0x248] sm:$0xf]  ;;  %v3611_v45 = vld [vmem:[#allocation5 + $0x1ec] sm:$0xf] }
  0x7c   :  { %1465 = vmatpush.bf16.msra.mxu3 %v3093_v54  ;;  %v2744_v54 = vld [vmem:[#allocation5 + $0x268] sm:$0xf]  ;;  %v2489_v59 = vor.u32 %v3565_v50, %v2488_v49  ;;  %v3561_v63 = vld [vmem:[#allocation5 + $0x54] sm:$0xf0]  ;;  %v2557_v50 = vor.u32 %v3579_v41, %v2554_v42 }
  0x7d   :  { %v3593_v2 = vld [vmem:[#allocation5 + $0x154] sm:$0xf0]  ;;  %v2456_v11 = vld [vmem:[#allocation5 + $0x28] sm:$0xf] }
  0x7e   :  { %1424 = vmatpush.bf16.msra.mxu0 %v2693_v61  ;;  %1438 = vmatpush.bf16.msra.mxu1 %v2821_v0  ;;  %v2745_v61 = vor.u32 %v3629_v55, %v2744_v54  ;;  %v2600_v0 = vld [vmem:[#allocation5 + $0x148] sm:$0xf]  ;;  %v3589_v15 = vld [vmem:[#allocation5 + $0x134] sm:$0xf0] }
  0x7f   :  { %1452 = vmatpush.bf16.msra.mxu2 %v2949_v1  ;;  %v2873_v1 = vor.u32 %v3661_v58, %v2872_v56  ;;  %v2601_v9 = vor.u32 %v3593_v2, %v2600_v0  ;;  %v2584_v13 = vld [vmem:[#allocation5 + $0x128] sm:$0xf]  ;;  %v3621_v17 = vld [vmem:[#allocation5 + $0x234] sm:$0xf0]  ;;  %v3575_v56 = vld [vmem:[#allocation5 + $0xcc] sm:$0xf] }
  0x80   :  { %1466 = vmatpush.bf16.msra.mxu3 %v3077_v4  ;;  %v3625_v4 = vld [vmem:[#allocation5 + $0x254] sm:$0xf0]  ;;  %v2712_v16 = vld [vmem:[#allocation5 + $0x228] sm:$0xf]  ;;  %v2585_v25 = vor.u32 %v3589_v15, %v2584_v13  ;;  %v2538_v58 = vld [vmem:[#allocation5 + $0xd8] sm:$0xf0] }
  0x81   :  { %1425 = vmatmul.bf16.vlgmr.msra.gmra.mxu0 %v4117_v22  ;;  %1439 = vmatmul.bf16.vlgmr.msra.gmra.mxu1 %v4119_v23  ;;  %v2729_v10 = vor.u32 %v3625_v4, %v2728_v3  ;;  %v2440_v21 = vld [vmem:[#allocation5 + $0x8] sm:$0xf]  ;;  %v3553_v24 = vld [vmem:[#allocation5 + $0x14] sm:$0xf0] }
  0x82   :  { %1473 = vmatpush.bf16.msrb.mxu0 %v2553_v5  ;;  %1487 = vmatpush.bf16.msrb.mxu1 %v2681_v7  ;;  %v2856_v5 = vld [vmem:[#allocation5 + $0x348] sm:$0xf]  ;;  %v3657_v7 = vld [vmem:[#allocation5 + $0x354] sm:$0xf0]  ;;  %v2441_v38 = vor.u32 %v3553_v24, %v2440_v21  ;;  %v2634_v21 = vld [vmem:[#allocation5 + $0x198] sm:$0xf0] }
  0x83   :  { %1501 = vmatpush.bf16.msrb.mxu2 %v2809_v8  ;;  %1467 = vmatmul.bf16.vlgmr.msra.gmra.mxu3 %v4125_v39  ;;  %v2473_v8 = vor.u32 %v3561_v63, %v2472_v62  ;;  %v2857_v14 = vor.u32 %v3657_v7, %v2856_v5  ;;  %v2568_v27 = vld [vmem:[#allocation5 + $0x108] sm:$0xf]  ;;  %v3585_v28 = vld [vmem:[#allocation5 + $0x114] sm:$0xf0]  ;;  %v2541_v63 = vor.u32 %v3575_v56, %v2538_v58  ;;  %v3571_v5 = vld [vmem:[#allocation5 + $0xac] sm:$0xf] }
  0x84   :  { %1515 = vmatpush.bf16.msrb.mxu3 %v2937_v12  ;;  %1453 = vmatmul.bf16.vlgmr.msra.gmra.mxu2 %v4123_v35  ;;  %v3557_v12 = vld [vmem:[#allocation5 + $0x34] sm:$0xf0]  ;;  %v2696_v29 = vld [vmem:[#allocation5 + $0x208] sm:$0xf]  ;;  %v2569_v43 = vor.u32 %v3585_v28, %v2568_v27  ;;  %v2522_v7 = vld [vmem:[#allocation5 + $0xb8] sm:$0xf0] }
  0x85   :  { %v3617_v31 = vld [vmem:[#allocation5 + $0x214] sm:$0xf0]  ;;  %v3192_v37 = vld [vmem:[#allocation5 + $0x5e8] sm:$0xf] }
  0x86   :  { %1474 = vmatpush.bf16.msrb.mxu0 %v2537_v18  ;;  %1488 = vmatpush.bf16.msrb.mxu1 %v2665_v19  ;;  %v2840_v18 = vld [vmem:[#allocation5 + $0x328] sm:$0xf]  ;;  %v3653_v19 = vld [vmem:[#allocation5 + $0x334] sm:$0xf0]  ;;  %v2697_v44 = vor.u32 %v3617_v31, %v2696_v29 }
  0x87   :  { %1502 = vmatpush.bf16.msrb.mxu2 %v2793_v20  ;;  %v2457_v20 = vor.u32 %v3557_v12, %v2456_v11  ;;  %v2841_v30 = vor.u32 %v3653_v19, %v2840_v18  ;;  %v3709_v36 = vld [vmem:[#allocation5 + $0x4f4] sm:$0xf0]  ;;  %v3048_v51 = vld [vmem:[#allocation5 + $0x4c8] sm:$0xf]  ;;  %v2525_v12 = vor.u32 %v3571_v5, %v2522_v7  ;;  %v3567_v18 = vld [vmem:[#allocation5 + $0x8c] sm:$0xf] }
  0x88   :  { %1516 = vmatpush.bf16.msrb.mxu3 %v2921_v26  ;;  %v2713_v26 = vor.u32 %v3621_v17, %v2712_v16  ;;  %v3176_v53 = vld [vmem:[#allocation5 + $0x5c8] sm:$0xf]  ;;  %v3737_v55 = vld [vmem:[#allocation5 + $0x5d4] sm:$0xf0]  ;;  %v2506_v19 = vld [vmem:[#allocation5 + $0x98] sm:$0xf0] }
  0x89   :  { %v3177_v62 = vor.u32 %v3737_v55, %v3176_v53  ;;  %v3032_v0 = vld [vmem:[#allocation5 + $0x4a8] sm:$0xf]  ;;  %v3733_v4 = vld [vmem:[#allocation5 + $0x5b4] sm:$0xf0]  ;;  %v3551_v7 = vld [vmem:[#allocation5 + $0xc] sm:$0xf] }
  0x8a   :  { %1475 = vmatpush.bf16.msrb.mxu0 %v2521_v32  ;;  %1489 = vmatpush.bf16.msrb.mxu1 %v2649_v33  ;;  %v2824_v32 = vld [vmem:[#allocation5 + $0x308] sm:$0xf]  ;;  %v3649_v33 = vld [vmem:[#allocation5 + $0x314] sm:$0xf0] }
  0x8b   :  { %1503 = vmatpush.bf16.msrb.mxu2 %v2777_v34  ;;  %v3064_v34 = vld [vmem:[#allocation5 + $0x4e8] sm:$0xf]  ;;  %v3729_v17 = vld [vmem:[#allocation5 + $0x594] sm:$0xf0] }
  0x8c   :  { %1517 = vmatpush.bf16.msrb.mxu3 %v2905_v40  ;;  %v3741_v40 = vld [vmem:[#allocation5 + $0x5f4] sm:$0xf0]  ;;  %v3160_v2 = vld [vmem:[#allocation5 + $0x5a8] sm:$0xf] }
  0x8d   :  { %v3193_v49 = vor.u32 %v3741_v40, %v3192_v37  ;;  %v3161_v11 = vor.u32 %v3733_v4, %v3160_v2  ;;  %v3016_v13 = vld [vmem:[#allocation5 + $0x488] sm:$0xf]  ;;  %v3693_v28 = vld [vmem:[#allocation5 + $0x474] sm:$0xf0] }
  0x8e   :  { %1476 = vmatpush.bf16.msrb.mxu0 %v2505_v46  ;;  %1490 = vmatpush.bf16.msrb.mxu1 %v2633_v47  ;;  %v2682_v46 = vld [vmem:[#allocation5 + $0x1f8] sm:$0xf0]  ;;  %v2825_v47 = vor.u32 %v3649_v33, %v2824_v32  ;;  %v3144_v15 = vld [vmem:[#allocation5 + $0x588] sm:$0xf]  ;;  %v3725_v31 = vld [vmem:[#allocation5 + $0x574] sm:$0xf0] }
  0x8f   :  { %1504 = vmatpush.bf16.msrb.mxu2 %v2761_v48  ;;  %v3065_v48 = vor.u32 %v3709_v36, %v3064_v34  ;;  %v2685_v54 = vor.u32 %v3611_v45, %v2682_v46  ;;  %v3000_v27 = vld [vmem:[#allocation5 + $0x468] sm:$0xf]  ;;  %v3563_v32 = vld [vmem:[#allocation5 + $0x6c] sm:$0xf]  ;;  %v2490_v33 = vld [vmem:[#allocation5 + $0x78] sm:$0xf0] }
  0x90   :  { %1518 = vmatpush.bf16.msrb.mxu3 %v2889_v52  ;;  %v3705_v52 = vld [vmem:[#allocation5 + $0x4d4] sm:$0xf0]  ;;  %v3128_v29 = vld [vmem:[#allocation5 + $0x568] sm:$0xf]  ;;  %v3595_v34 = vld [vmem:[#allocation5 + $0x16c] sm:$0xf]  ;;  %v3001_v37 = vor.u32 %v3693_v28, %v3000_v27  ;;  %v2493_v40 = vor.u32 %v3563_v32, %v2490_v33 }
  0x91   :  { %v2618_v36 = vld [vmem:[#allocation5 + $0x178] sm:$0xf0]  ;;  %v2984_v41 = vld [vmem:[#allocation5 + $0x448] sm:$0xf]  ;;  %v3689_v42 = vld [vmem:[#allocation5 + $0x454] sm:$0xf0] }
  0x92   :  { %1477 = vmatpush.bf16.msrb.mxu0 %v2489_v59  ;;  %1491 = vmatpush.bf16.msrb.mxu1 %v2617_v60  ;;  %v3607_v59 = vld [vmem:[#allocation5 + $0x1cc] sm:$0xf]  ;;  %v2666_v60 = vld [vmem:[#allocation5 + $0x1d8] sm:$0xf0]  ;;  %v3721_v45 = vld [vmem:[#allocation5 + $0x554] sm:$0xf0] }
  0x93   :  { %1505 = vmatpush.bf16.msrb.mxu2 %v2745_v61  ;;  %v3049_v61 = vor.u32 %v3705_v52, %v3048_v51  ;;  %v2669_v3 = vor.u32 %v3607_v59, %v2666_v60  ;;  %v3559_v46 = vld [vmem:[#allocation5 + $0x4c] sm:$0xf]  ;;  %v2968_v53 = vld [vmem:[#allocation5 + $0x428] sm:$0xf]  ;;  %v3717_v58 = vld [vmem:[#allocation5 + $0x534] sm:$0xf0] }
  0x94   :  { %1519 = vmatpush.bf16.msrb.mxu3 %v2873_v1  ;;  %v3701_v1 = vld [vmem:[#allocation5 + $0x4b4] sm:$0xf0]  ;;  %v3096_v55 = vld [vmem:[#allocation5 + $0x528] sm:$0xf]  ;;  %v3555_v59 = vld [vmem:[#allocation5 + $0x2c] sm:$0xf] }
  0x95   :  { %v2458_v60 = vld [vmem:[#allocation5 + $0x38] sm:$0xf0]  ;;  %v3097_v2 = vor.u32 %v3717_v58, %v3096_v55  ;;  %v3080_v4 = vld [vmem:[#allocation5 + $0x508] sm:$0xf]  ;;  %v3713_v5 = vld [vmem:[#allocation5 + $0x514] sm:$0xf0] }
  0x96   :  { %1478 = vmatpush.bf16.msrb.mxu0 %v2473_v8  ;;  %1492 = vmatpush.bf16.msrb.mxu1 %v2601_v9  ;;  %v3603_v8 = vld [vmem:[#allocation5 + $0x1ac] sm:$0xf]  ;;  %v2650_v9 = vld [vmem:[#allocation5 + $0x1b8] sm:$0xf0] }
  0x97   :  { %1506 = vmatpush.bf16.msrb.mxu2 %v2729_v10  ;;  %v3033_v10 = vor.u32 %v3701_v1, %v3032_v0  ;;  %v2653_v16 = vor.u32 %v3603_v8, %v2650_v9  ;;  %v2952_v0 = vld [vmem:[#allocation5 + $0x408] sm:$0xf]  ;;  %v3681_v1 = vld [vmem:[#allocation5 + $0x414] sm:$0xf0]  ;;  %v2442_v9 = vld [vmem:[#allocation5 + $0x18] sm:$0xf0] }
  0x98   :  { %1520 = vmatpush.bf16.msrb.mxu3 %v2857_v14  ;;  %v3697_v14 = vld [vmem:[#allocation5 + $0x494] sm:$0xf0]  ;;  %v2922_v33 = vld [vmem:[#allocation5 + $0x3d8] sm:$0xf0]  ;;  %v3631_v55 = vld [vmem:[#allocation5 + $0x28c] sm:$0xf] }
  0x99   :  { %v3017_v24 = vor.u32 %v3697_v14, %v3016_v13  ;;  %v2810_v13 = vld [vmem:[#allocation5 + $0x2f8] sm:$0xf0]  ;;  %v3675_v14 = vld [vmem:[#allocation5 + $0x3ec] sm:$0xf] }
  0x9a   :  { %1479 = vmatpush.bf16.msrb.mxu0 %v2457_v20  ;;  %1493 = vmatpush.bf16.msrb.mxu1 %v2585_v25  ;;  %v3599_v20 = vld [vmem:[#allocation5 + $0x18c] sm:$0xf]  ;;  %v3145_v25 = vor.u32 %v3729_v17, %v3144_v15  ;;  %v2953_v15 = vor.u32 %v3681_v1, %v2952_v0 }
  0x9b   :  { %1507 = vmatpush.bf16.msrb.mxu2 %v2713_v26  ;;  %v2509_v26 = vor.u32 %v3567_v18, %v2506_v19  ;;  %v3707_v17 = vld [vmem:[#allocation5 + $0x4ec] sm:$0xf]  ;;  %v3066_v18 = vld [vmem:[#allocation5 + $0x4f8] sm:$0xf0]  ;;  %v3081_v19 = vor.u32 %v3713_v5, %v3080_v4 }
  0x9c   :  { %1521 = vmatpush.bf16.msrb.mxu3 %v2841_v30  ;;  %v2637_v30 = vor.u32 %v3599_v20, %v2634_v21  ;;  %v2445_v20 = vor.u32 %v3551_v7, %v2442_v9  ;;  %v3739_v21 = vld [vmem:[#allocation5 + $0x5ec] sm:$0xf]  ;;  %v3069_v28 = vor.u32 %v3707_v17, %v3066_v18  ;;  %v2874_v7 = vld [vmem:[#allocation5 + $0x378] sm:$0xf0] }
  0x9d   :  { %v3663_v58 = vld [vmem:[#allocation5 + $0x38c] sm:$0xf]  ;;  %v3002_v9 = vld [vmem:[#allocation5 + $0x478] sm:$0xf0] }
  0x9e   :  { %1480 = vmatpush.bf16.msrb.mxu0 %v2441_v38  ;;  %1494 = vmatpush.bf16.msrb.mxu1 %v2569_v43  ;;  %v3129_v38 = vor.u32 %v3725_v31, %v3128_v29  ;;  %v3112_v43 = vld [vmem:[#allocation5 + $0x548] sm:$0xf]  ;;  %v3639_v29 = vld [vmem:[#allocation5 + $0x2cc] sm:$0xf] }
  0x9f   :  { %1508 = vmatpush.bf16.msrb.mxu2 %v2697_v44  ;;  %v2621_v44 = vor.u32 %v3595_v34, %v2618_v36  ;;  %v3113_v51 = vor.u32 %v3721_v45, %v3112_v43  ;;  %v3671_v31 = vld [vmem:[#allocation5 + $0x3cc] sm:$0xf]  ;;  %v3050_v36 = vld [vmem:[#allocation5 + $0x4d8] sm:$0xf0] }
  0xa0   :  { %1522 = vmatpush.bf16.msrb.mxu3 %v2825_v47  ;;  %v2474_v47 = vld [vmem:[#allocation5 + $0x58] sm:$0xf0]  ;;  %v3703_v34 = vld [vmem:[#allocation5 + $0x4cc] sm:$0xf] }
  0xa1   :  { %1481 = vmatmul.bf16.vlgmr.msrb.gmra.mxu0 %v4111_v57  ;;  %1495 = vmatmul.bf16.vlgmr.msrb.gmra.mxu1 %v4114_v6  ;;  %v2477_v52 = vor.u32 %v3559_v46, %v2474_v47  ;;  %v3635_v43 = vld [vmem:[#allocation5 + $0x2ac] sm:$0xf]  ;;  %v2906_v47 = vld [vmem:[#allocation5 + $0x3b8] sm:$0xf0] }
  0xa2   :  { %1529 = vmatpush.bf16.msra.mxu0 %v3065_v48  ;;  %1543 = vmatpush.bf16.msra.mxu1 %v3193_v49  ;;  %v3591_v48 = vld [vmem:[#allocation5 + $0x14c] sm:$0xf]  ;;  %v2602_v49 = vld [vmem:[#allocation5 + $0x158] sm:$0xf0] }
  0xa3   :  { %1557 = vmatpush.bf16.msra.mxu2 %v2557_v50  ;;  %1523 = vmatmul.bf16.vlgmr.msrb.gmra.mxu3 %v4119_v23  ;;  %v2985_v50 = vor.u32 %v3689_v42, %v2984_v41  ;;  %v2605_v56 = vor.u32 %v3591_v48, %v2602_v49  ;;  %v2925_v41 = vor.u32 %v3671_v31, %v2922_v33  ;;  %v3667_v45 = vld [vmem:[#allocation5 + $0x3ac] sm:$0xf]  ;;  %v3034_v49 = vld [vmem:[#allocation5 + $0x4b8] sm:$0xf0] }
  0xa4   :  { %1571 = vmatpush.bf16.msra.mxu3 %v2685_v54  ;;  %1509 = vmatmul.bf16.vlgmr.msrb.gmra.mxu2 %v4117_v22  ;;  %v3685_v54 = vld [vmem:[#allocation5 + $0x434] sm:$0xf0]  ;;  %v3053_v42 = vor.u32 %v3703_v34, %v3050_v36  ;;  %v3699_v48 = vld [vmem:[#allocation5 + $0x4ac] sm:$0xf]  ;;  %v2714_v31 = vld [vmem:[#allocation5 + $0x238] sm:$0xf0] }
  0xa5   :  { %v3659_v4 = vld [vmem:[#allocation5 + $0x36c] sm:$0xf]  ;;  %v2842_v34 = vld [vmem:[#allocation5 + $0x338] sm:$0xf0] }
  0xa6   :  { %1530 = vmatpush.bf16.msra.mxu0 %v3049_v61  ;;  %1544 = vmatpush.bf16.msra.mxu1 %v3177_v62  ;;  %v3587_v61 = vld [vmem:[#allocation5 + $0x12c] sm:$0xf]  ;;  %v2586_v62 = vld [vmem:[#allocation5 + $0x138] sm:$0xf0] }
  0xa7   :  { %1558 = vmatpush.bf16.msra.mxu2 %v2541_v63  ;;  %v2969_v63 = vor.u32 %v3685_v54, %v2968_v53  ;;  %v2589_v8 = vor.u32 %v3587_v61, %v2586_v62  ;;  %v2909_v53 = vor.u32 %v3667_v45, %v2906_v47  ;;  %v3037_v54 = vor.u32 %v3699_v48, %v3034_v49  ;;  %v3695_v61 = vld [vmem:[#allocation5 + $0x48c] sm:$0xf]  ;;  %v3018_v62 = vld [vmem:[#allocation5 + $0x498] sm:$0xf0] }
  0xa8   :  { %1572 = vmatpush.bf16.msra.mxu3 %v2669_v3  ;;  %v2461_v3 = vor.u32 %v3555_v59, %v2458_v60  ;;  %v2890_v60 = vld [vmem:[#allocation5 + $0x398] sm:$0xf0]  ;;  %v3655_v17 = vld [vmem:[#allocation5 + $0x34c] sm:$0xf] }
  0xa9   :  { %v2893_v1 = vor.u32 %v3663_v58, %v2890_v60  ;;  %v3683_v36 = vld [vmem:[#allocation5 + $0x42c] sm:$0xf]  ;;  %v2826_v48 = vld [vmem:[#allocation5 + $0x318] sm:$0xf0] }
  0xaa   :  { %1531 = vmatpush.bf16.msra.mxu0 %v3033_v10  ;;  %1545 = vmatpush.bf16.msra.mxu1 %v3161_v11  ;;  %v3583_v10 = vld [vmem:[#allocation5 + $0x10c] sm:$0xf]  ;;  %v2570_v11 = vld [vmem:[#allocation5 + $0x118] sm:$0xf0] }
  0xab   :  { %1559 = vmatpush.bf16.msra.mxu2 %v2525_v12  ;;  %v3643_v12 = vld [vmem:[#allocation5 + $0x2ec] sm:$0xf]  ;;  %v3773_v60 = vld [vmem:[#allocation8 + $0xf4] sm:$0xf0] }
  0xac   :  { %1573 = vmatpush.bf16.msra.mxu3 %v2653_v16  ;;  %v2938_v16 = vld [vmem:[#allocation5 + $0x3f8] sm:$0xf0]  ;;  %v3647_v47 = vld [vmem:[#allocation5 + $0x30c] sm:$0xf] }
  0xad   :  { %v2941_v27 = vor.u32 %v3675_v14, %v2938_v16  ;;  %v2730_v16 = vld [vmem:[#allocation5 + $0x258] sm:$0xf0] }
  0xae   :  { %1532 = vmatpush.bf16.msra.mxu0 %v3017_v24  ;;  %1546 = vmatpush.bf16.msra.mxu1 %v3145_v25  ;;  %v3194_v24 = vld [vmem:[#allocation5 + $0x5f8] sm:$0xf0]  ;;  %v2573_v25 = vor.u32 %v3583_v10, %v2570_v11  ;;  %v3723_v10 = vld [vmem:[#allocation5 + $0x56c] sm:$0xf] }
  0xaf   :  { %1560 = vmatpush.bf16.msra.mxu2 %v2509_v26  ;;  %v2813_v26 = vor.u32 %v3643_v12, %v2810_v13  ;;  %v3197_v32 = vor.u32 %v3739_v21, %v3194_v24  ;;  %v3130_v11 = vld [vmem:[#allocation5 + $0x578] sm:$0xf0]  ;;  %v2877_v13 = vor.u32 %v3659_v4, %v2874_v7  ;;  %v3719_v24 = vld [vmem:[#allocation5 + $0x54c] sm:$0xf]  ;;  %v3312_v7 = vld [vmem:[#allocation8 + $0xe0] sm:$0xf] }
  0xb0   :  { %1574 = vmatpush.bf16.msra.mxu3 %v2637_v30  ;;  %v2794_v30 = vld [vmem:[#allocation5 + $0x2d8] sm:$0xf0]  ;;  %v3133_v18 = vor.u32 %v3723_v10, %v3130_v11 }
  0xb1   :  { %v2986_v21 = vld [vmem:[#allocation5 + $0x458] sm:$0xf0] }
  0xb2   :  { %1533 = vmatpush.bf16.msra.mxu0 %v3001_v37  ;;  %1547 = vmatpush.bf16.msra.mxu1 %v3129_v38  ;;  %v3735_v37 = vld [vmem:[#allocation5 + $0x5cc] sm:$0xf]  ;;  %v3178_v38 = vld [vmem:[#allocation5 + $0x5d8] sm:$0xf0] }
  0xb3   :  { %1561 = vmatpush.bf16.msra.mxu2 %v2493_v40  ;;  %v2797_v40 = vor.u32 %v3639_v29, %v2794_v30  ;;  %v3181_v46 = vor.u32 %v3735_v37, %v3178_v38  ;;  %v3619_v30 = vld [vmem:[#allocation5 + $0x22c] sm:$0xf]  ;;  %v2970_v37 = vld [vmem:[#allocation5 + $0x438] sm:$0xf0] }
  0xb4   :  { %1575 = vmatpush.bf16.msra.mxu3 %v2621_v44  ;;  %v2778_v44 = vld [vmem:[#allocation5 + $0x2b8] sm:$0xf0]  ;;  %v2973_v45 = vor.u32 %v3683_v36, %v2970_v37 }
  0xb5   :  { %v3765_v36 = vld [vmem:[#allocation8 + $0xb4] sm:$0xf0] }
  0xb6   :  { %1534 = vmatpush.bf16.msra.mxu0 %v2985_v50  ;;  %1548 = vmatpush.bf16.msra.mxu1 %v3113_v51  ;;  %v3731_v50 = vld [vmem:[#allocation5 + $0x5ac] sm:$0xf]  ;;  %v3162_v51 = vld [vmem:[#allocation5 + $0x5b8] sm:$0xf0] }
  0xb7   :  { %1562 = vmatpush.bf16.msra.mxu2 %v2477_v52  ;;  %v2781_v52 = vor.u32 %v3635_v43, %v2778_v44  ;;  %v3165_v59 = vor.u32 %v3731_v50, %v3162_v51  ;;  %v3615_v43 = vld [vmem:[#allocation5 + $0x20c] sm:$0xf]  ;;  %v2954_v51 = vld [vmem:[#allocation5 + $0x418] sm:$0xf0] }
  0xb8   :  { %1576 = vmatpush.bf16.msra.mxu3 %v2605_v56  ;;  %v2762_v56 = vld [vmem:[#allocation5 + $0x298] sm:$0xf0]  ;;  %v3679_v50 = vld [vmem:[#allocation5 + $0x40c] sm:$0xf] }
  0xb9   :  { %v2765_v0 = vor.u32 %v3631_v55, %v2762_v56  ;;  %v3757_v55 = vld [vmem:[#allocation8 + $0x74] sm:$0xf0]  ;;  %v4145_v56 = vld [vmem:[#allocation7] sm:$0xf] }
  0xba   :  { %1535 = vmatpush.bf16.msra.mxu0 %v2969_v63  ;;  %1549 = vmatpush.bf16.msra.mxu1 %v3097_v2  ;;  %v3727_v63 = vld [vmem:[#allocation5 + $0x58c] sm:$0xf] }
  0xbb   :  { %1563 = vmatpush.bf16.msra.mxu2 %v2461_v3  ;;  %v3627_v2 = vld [vmem:[#allocation5 + $0x26c] sm:$0xf]  ;;  %v2746_v3 = vld [vmem:[#allocation5 + $0x278] sm:$0xf0] }
  0xbc   :  { %1577 = vmatpush.bf16.msra.mxu3 %v2589_v8  ;;  %v3691_v8 = vld [vmem:[#allocation5 + $0x46c] sm:$0xf]  ;;  %v2749_v12 = vor.u32 %v3627_v2, %v2746_v3  ;;  %v3248_v2 = vld [vmem:[#allocation8 + $0x60] sm:$0xf] }
  0xbd   :  { %v3005_v14 = vor.u32 %v3691_v8, %v3002_v9  ;;  %v3755_v3 = vld [vmem:[#allocation8 + $0x64] sm:$0xf0] }
  0xbe   :  { %1536 = vmatpush.bf16.msra.mxu0 %v2953_v15  ;;  %1550 = vmatpush.bf16.msra.mxu1 %v3081_v19  ;;  %v3623_v15 = vld [vmem:[#allocation5 + $0x24c] sm:$0xf]  ;;  %v2858_v19 = vld [vmem:[#allocation5 + $0x358] sm:$0xf0]  ;;  %v4143_v38 = vpop.f32.mrf.mxu1  ;;  %v3249_v9 = vor.u32 %v3755_v3, %v3248_v2  ;;  %v3772_v2 = vld [vmem:[#allocation8 + $0xf4] sm:$0xf] }
  0xbf   :  { %1564 = vmatpush.bf16.msra.mxu2 %v2445_v20  ;;  %v3687_v20 = vld [vmem:[#allocation5 + $0x44c] sm:$0xf]  ;;  %v3322_v3 = vld [vmem:[#allocation8 + $0xf8] sm:$0xf0] }
  0xc0   :  { %1578 = vmatpush.bf16.msra.mxu3 %v2573_v25  ;;  %v3114_v25 = vld [vmem:[#allocation5 + $0x558] sm:$0xf0]  ;;  %v3771_v8 = vld [vmem:[#allocation8 + $0xe4] sm:$0xf0] }
  0xc1   :  { %1537 = vmatmul.bf16.vlgmr.msra.gmra.mxu0 %v4123_v35  ;;  %1551 = vmatmul.bf16.vlgmr.msra.gmra.mxu1 %v4125_v39  ;;  %v3117_v33 = vor.u32 %v3719_v24, %v3114_v25 }
  0xc2   :  { %1585 = vmatpush.bf16.msrb.mxu0 %v2813_v26  ;;  %1599 = vmatpush.bf16.msrb.mxu1 %v2941_v27  ;;  %v2733_v26 = vor.u32 %v3623_v15, %v2730_v16  ;;  %v2861_v27 = vor.u32 %v3655_v17, %v2858_v19  ;;  %v1314_v29 = vpop.f32.mrf.mxu0  ;;  %v3313_v15 = vor.u32 %v3771_v8, %v3312_v7  ;;  %v3304_v16 = vld [vmem:[#allocation8 + $0xd0] sm:$0xf]  ;;  %v3769_v17 = vld [vmem:[#allocation8 + $0xd4] sm:$0xf0] }
  0xc3   :  { %1613 = vmatpush.bf16.msrb.mxu2 %v3069_v28  ;;  %1579 = vmatmul.bf16.vlgmr.msra.gmra.mxu3 %v4114_v6  ;;  %v3021_v6 = vor.u32 %v3695_v61, %v3018_v62  ;;  %v2989_v28 = vor.u32 %v3687_v20, %v2986_v21  ;;  %v2829_v61 = vor.u32 %v3647_v47, %v2826_v48  ;;  %v3232_v21 = vld [vmem:[#allocation8 + $0x40] sm:$0xf] }
  0xc4   :  { %1627 = vmatpush.bf16.msrb.mxu3 %v3197_v32  ;;  %1565 = vmatmul.bf16.vlgmr.msra.gmra.mxu2 %v4111_v57  ;;  %v3146_v57 = vld [vmem:[#allocation5 + $0x598] sm:$0xf0]  ;;  %v3651_v32 = vld [vmem:[#allocation5 + $0x32c] sm:$0xf]  ;;  %v2957_v62 = vor.u32 %v3679_v50, %v2954_v51  ;;  %v3305_v24 = vor.u32 %v3769_v17, %v3304_v16  ;;  %v3208_v50 = vld [vmem:[#allocation8 + $0x10] sm:$0xf] }
  0xc5   :  { %v3149_v5 = vor.u32 %v3727_v63, %v3146_v57  ;;  %v2845_v44 = vor.u32 %v3651_v32, %v2842_v34  ;;  %v3288_v34 = vld [vmem:[#allocation8 + $0xb0] sm:$0xf]  ;;  %v3745_v51 = vld [vmem:[#allocation8 + $0x14] sm:$0xf0]  ;;  %v3314_v16 = vld [vmem:[#allocation8 + $0xe8] sm:$0xf0] }
  0xc6   :  { %1586 = vmatpush.bf16.msrb.mxu0 %v2797_v40  ;;  %1600 = vmatpush.bf16.msrb.mxu1 %v2925_v41  ;;  %v3715_v40 = vld [vmem:[#allocation5 + $0x52c] sm:$0xf]  ;;  %v3098_v41 = vld [vmem:[#allocation5 + $0x538] sm:$0xf0]  ;;  %v1356_v10 = vpop.f32.mrf.mxu3 }
  0xc7   :  { %1614 = vmatpush.bf16.msrb.mxu2 %v3053_v42  ;;  %v2717_v42 = vor.u32 %v3619_v30, %v2714_v31  ;;  %v3101_v49 = vor.u32 %v3715_v40, %v3098_v41  ;;  %v3224_v31 = vld [vmem:[#allocation8 + $0x30] sm:$0xf]  ;;  %v3216_v41 = vld [vmem:[#allocation8 + $0x20] sm:$0xf] }
  0xc8   :  { %1628 = vmatpush.bf16.msrb.mxu3 %v3181_v46  ;;  %v2698_v46 = vld [vmem:[#allocation5 + $0x218] sm:$0xf0] }
  0xc9   :  { %v2701_v58 = vor.u32 %v3615_v43, %v2698_v46  ;;  %v3289_v43 = vor.u32 %v3765_v36, %v3288_v34  ;;  %v3368_v36 = vld [vmem:[#allocation8 + $0x150] sm:$0xf] }
  0xca   :  { %1587 = vmatpush.bf16.msrb.mxu0 %v2781_v52  ;;  %1601 = vmatpush.bf16.msrb.mxu1 %v2909_v53  ;;  %v3711_v52 = vld [vmem:[#allocation5 + $0x50c] sm:$0xf]  ;;  %v3082_v53 = vld [vmem:[#allocation5 + $0x518] sm:$0xf0] }
  0xcb   :  { %1615 = vmatpush.bf16.msrb.mxu2 %v3037_v54  ;;  %v3256_v54 = vld [vmem:[#allocation8 + $0x70] sm:$0xf]  ;;  %v3085_v63 = vor.u32 %v3711_v52, %v3082_v53 }
  0xcc   :  { %1629 = vmatpush.bf16.msrb.mxu3 %v3165_v59  ;;  %v3320_v59 = vld [vmem:[#allocation8 + $0xf0] sm:$0xf]  ;;  %v3257_v57 = vor.u32 %v3757_v55, %v3256_v54  ;;  %v3761_v55 = vld [vmem:[#allocation8 + $0x94] sm:$0xf0] }
  0xcd   :  { %v3321_v4 = vor.u32 %v3773_v60, %v3320_v59  ;;  %v3272_v54 = vld [vmem:[#allocation8 + $0x90] sm:$0xf] }
  0xce   :  { %1588 = vmatpush.bf16.msrb.mxu0 %v2765_v0  ;;  %1602 = vmatpush.bf16.msrb.mxu1 %v2893_v1  ;;  %v337_v1 = vperm.slane %v4145_v56, 0 }
  0xcf   :  { %1616 = vmatpush.bf16.msrb.mxu2 %v3021_v6  ;;  %v1342_v0 = vpop.f32.mrf.mxu2  ;;  %v1316_v6 = vpop.f32.mrf.mxu0 }
  0xd0   :  { %1630 = vmatpush.bf16.msrb.mxu3 %v3149_v5  ;;  %v1330_v5 = vpop.f32.mrf.mxu1  ;;  %v1315_v11 = vadd.f32 %v1314_v29, %v337_v1 }
  0xd2   :  { %1589 = vmatpush.bf16.msrb.mxu0 %v2749_v12  ;;  %1603 = vmatpush.bf16.msrb.mxu1 %v2877_v13  ;;  %v1317_v12 = vadd.f32 %v1316_v6, %v337_v1  ;;  %v3240_v13 = vld [vmem:[#allocation8 + $0x50] sm:$0xf]  ;;  %v1329_v19 = vadd.f32 %v4143_v38, %v1315_v11  ;;  %v3264_v1 = vld [vmem:[#allocation8 + $0x80] sm:$0xf]  ;;  %v3759_v6 = vld [vmem:[#allocation8 + $0x84] sm:$0xf0] }
  0xd3   :  { %1617 = vmatpush.bf16.msrb.mxu2 %v3005_v14  ;;  %v3753_v14 = vld [vmem:[#allocation8 + $0x54] sm:$0xf0]  ;;  %v3265_v11 = vor.u32 %v3759_v6, %v3264_v1 }
  0xd4   :  { %1631 = vmatpush.bf16.msrb.mxu3 %v3133_v18  ;;  %v3241_v18 = vor.u32 %v3753_v14, %v3240_v13  ;;  %v1331_v20 = vadd.f32 %v1330_v5, %v1317_v12  ;;  %v1343_v29 = vadd.f32 %v1342_v0, %v1329_v19  ;;  %v3258_v0 = vld [vmem:[#allocation8 + $0x78] sm:$0xf0]  ;;  %v3754_v12 = vld [vmem:[#allocation8 + $0x64] sm:$0xf]  ;;  %v3250_v13 = vld [vmem:[#allocation8 + $0x68] sm:$0xf0]  ;;  %v3325_v14 = vor.u32 %v3772_v2, %v3322_v3 }
  0xd5   :  { %v3253_v19 = vor.u32 %v3754_v12, %v3250_v13  ;;  %v3744_v2 = vld [vmem:[#allocation8 + $0x14] sm:$0xf]  ;;  %v3360_v3 = vld [vmem:[#allocation8 + $0x140] sm:$0xf]  ;;  %v3274_v13 = vld [vmem:[#allocation8 + $0x98] sm:$0xf0] }
  0xd6   :  { %1590 = vmatpush.bf16.msrb.mxu0 %v2733_v26  ;;  %1604 = vmatpush.bf16.msrb.mxu1 %v2861_v27  ;;  %v3296_v26 = vld [vmem:[#allocation8 + $0xc0] sm:$0xf]  ;;  %v3767_v27 = vld [vmem:[#allocation8 + $0xc4] sm:$0xf0]  ;;  %v1357_v38 = vadd.f32 %v1356_v10, %v1343_v29  ;;  %v3760_v12 = vld [vmem:[#allocation8 + $0x94] sm:$0xf] }
  0xd7   :  { %1618 = vmatpush.bf16.msrb.mxu2 %v2989_v28  ;;  %v1344_v25 = vpop.f32.mrf.mxu2  ;;  %v3297_v32 = vor.u32 %v3767_v27, %v3296_v26  ;;  %v3768_v26 = vld [vmem:[#allocation8 + $0xd4] sm:$0xf]  ;;  %v3306_v27 = vld [vmem:[#allocation8 + $0xd8] sm:$0xf0] }
  0xd8   :  { %1632 = vmatpush.bf16.msrb.mxu3 %v3117_v33  ;;  %v1345_v30 = vadd.f32 %v1344_v25, %v1331_v20  ;;  %v1358_v33 = vpop.f32.mrf.mxu3  ;;  %v3752_v20 = vld [vmem:[#allocation8 + $0x54] sm:$0xf]  ;;  %v3789_v25 = vld [vmem:[#allocation8 + $0x174] sm:$0xf0]  ;;  %v3309_v34 = vor.u32 %v3768_v26, %v3306_v27  ;;  %v3758_v26 = vld [vmem:[#allocation8 + $0x84] sm:$0xf] }
  0xd9   :  { %v3266_v27 = vld [vmem:[#allocation8 + $0x88] sm:$0xf0] }
  0xda   :  { %1591 = vmatpush.bf16.msrb.mxu0 %v2717_v42  ;;  %1605 = vmatpush.bf16.msrb.mxu1 %v2845_v44  ;;  %v1359_v40 = vadd.f32 %v1358_v33, %v1345_v30  ;;  %v3747_v42 = vld [vmem:[#allocation8 + $0x24] sm:$0xf0]  ;;  %v3280_v44 = vld [vmem:[#allocation8 + $0xa0] sm:$0xf]  ;;  %v3234_v33 = vld [vmem:[#allocation8 + $0x48] sm:$0xf0] }
  0xdb   :  { %1619 = vmatpush.bf16.msrb.mxu2 %v2973_v45  ;;  %v3763_v45 = vld [vmem:[#allocation8 + $0xa4] sm:$0xf0]  ;;  %v3217_v47 = vor.u32 %v3747_v42, %v3216_v41  ;;  %v3298_v41 = vld [vmem:[#allocation8 + $0xc8] sm:$0xf0] }
  0xdc   :  { %1633 = vmatpush.bf16.msrb.mxu3 %v3101_v49  ;;  %v3281_v52 = vor.u32 %v3763_v45, %v3280_v44 }
  0xde   :  { %1592 = vmatpush.bf16.msrb.mxu0 %v2701_v58  ;;  %1606 = vmatpush.bf16.msrb.mxu1 %v2829_v61  ;;  %v1370_v28 = vpop.f32.mrf.mxu0  ;;  %v3209_v58 = vor.u32 %v3745_v51, %v3208_v50  ;;  %v3200_v61 = vld [vmem:[#allocation8] sm:$0xf]  ;;  %v3764_v51 = vld [vmem:[#allocation8 + $0xb4] sm:$0xf] }
  0xdf   :  { %1620 = vmatpush.bf16.msrb.mxu2 %v2957_v62  ;;  %v1371_v48 = vadd.f32 %v1370_v28, %v1357_v38  ;;  %v3743_v62 = vld [vmem:[#allocation8 + $0x4] sm:$0xf0] }
  0xe0   :  { %1634 = vmatpush.bf16.msrb.mxu3 %v3085_v63  ;;  %v3756_v63 = vld [vmem:[#allocation8 + $0x74] sm:$0xf] }
  0xe1   :  { %1593 = vmatmul.bf16.vlgmr.msrb.gmra.mxu0 %v4117_v22  ;;  %1607 = vmatmul.bf16.vlgmr.msrb.gmra.mxu1 %v4119_v23  ;;  %v3751_v22 = vld [vmem:[#allocation8 + $0x44] sm:$0xf0] }
  0xe2   :  { %2043 = vmatpush.bf16.msra.mxu0 %v3257_v57  ;;  %2057 = vmatpush.bf16.msra.mxu1 %v3321_v4  ;;  %v3233_v23 = vor.u32 %v3751_v22, %v3232_v21  ;;  %v3273_v57 = vor.u32 %v3761_v55, %v3272_v54  ;;  %v3201_v4 = vor.u32 %v3743_v62, %v3200_v61  ;;  %v3242_v21 = vld [vmem:[#allocation8 + $0x58] sm:$0xf0]  ;;  %v3746_v55 = vld [vmem:[#allocation8 + $0x24] sm:$0xf]  ;;  %v3282_v62 = vld [vmem:[#allocation8 + $0xa8] sm:$0xf0] }
  0xe3   :  { %1621 = vmatmul.bf16.vlgmr.msrb.gmra.mxu2 %v4123_v35  ;;  %1635 = vmatmul.bf16.vlgmr.msrb.gmra.mxu3 %v4125_v39  ;;  %v1384_v35 = vpop.f32.mrf.mxu1  ;;  %v3749_v39 = vld [vmem:[#allocation8 + $0x34] sm:$0xf0]  ;;  %v3245_v30 = vor.u32 %v3752_v20, %v3242_v21  ;;  %v3762_v61 = vld [vmem:[#allocation8 + $0xa4] sm:$0xf]  ;;  %v3779_v20 = vld [vmem:[#allocation8 + $0x124] sm:$0xf0] }
  0xe4   :  { %v3225_v37 = vor.u32 %v3749_v39, %v3224_v31  ;;  %v1385_v59 = vadd.f32 %v1384_v35, %v1371_v48  ;;  %v3787_v35 = vld [vmem:[#allocation8 + $0x164] sm:$0xf0]  ;;  %v3750_v31 = vld [vmem:[#allocation8 + $0x44] sm:$0xf]  ;;  %v3226_v48 = vld [vmem:[#allocation8 + $0x38] sm:$0xf0] }
  0xe5   :  { %v3237_v44 = vor.u32 %v3750_v31, %v3234_v33  ;;  %v3742_v21 = vld [vmem:[#allocation8 + $0x4] sm:$0xf]  ;;  %v3269_v33 = vor.u32 %v3758_v26, %v3266_v27  ;;  %v3795_v26 = vld [vmem:[#allocation8 + $0x1a4] sm:$0xf0] }
  0xe6   :  { %2044 = vmatpush.bf16.msra.mxu0 %v3249_v9  ;;  %2058 = vmatpush.bf16.msra.mxu1 %v3313_v15  ;;  %v1372_v46 = vpop.f32.mrf.mxu0  ;;  %v1641_v7 = vmax.f32 %v1385_v59, 0.0  ;;  %v3261_v9 = vor.u32 %v3756_v63, %v3258_v0  ;;  %v1412_v10 = vpop.f32.mrf.mxu3  ;;  %v3770_v15 = vld [vmem:[#allocation8 + $0xe4] sm:$0xf] }
  0xe7   :  { %v1373_v49 = vadd.f32 %v1372_v46, %v1359_v40  ;;  %v1398_v5 = vpop.f32.mrf.mxu2  ;;  %v3317_v22 = vor.u32 %v3770_v15, %v3314_v16  ;;  %v3766_v40 = vld [vmem:[#allocation8 + $0xc4] sm:$0xf] }
  0xea   :  { %2045 = vmatpush.bf16.msra.mxu0 %v3241_v18  ;;  %2059 = vmatpush.bf16.msra.mxu1 %v3305_v24  ;;  %v338_v18 = vperm.slane %v4145_v56, 1  ;;  %v3384_v24 = vld [vmem:[#allocation8 + $0x170] sm:$0xf] }
  0xeb   :  { %v1386_v53 = vpop.f32.mrf.mxu1  ;;  %v3385_v28 = vor.u32 %v3789_v25, %v3384_v24  ;;  %v3277_v24 = vor.u32 %v3760_v12, %v3274_v13  ;;  %v3416_v13 = vld [vmem:[#allocation8 + $0x1b0] sm:$0xf] }
  0xec   :  { %v1387_v60 = vadd.f32 %v1386_v53, %v1373_v49  ;;  %v1399_v29 = vadd.f32 %v1398_v5, %v338_v18  ;;  %v3301_v49 = vor.u32 %v3766_v40, %v3298_v41  ;;  %v3210_v5 = vld [vmem:[#allocation8 + $0x18] sm:$0xf0]  ;;  %v3328_v41 = vld [vmem:[#allocation8 + $0x100] sm:$0xf] }
  0xed   :  { %2071 = vmatpush.bf16.msra.mxu2 %v3385_v28 }
  0xee   :  { %2046 = vmatpush.bf16.msra.mxu0 %v3233_v23  ;;  %2060 = vmatpush.bf16.msra.mxu1 %v3297_v32  ;;  %v1645_v8 = vmax.f32 %v1387_v60, 0.0  ;;  %v3376_v23 = vld [vmem:[#allocation8 + $0x160] sm:$0xf]  ;;  %v1414_v38 = vpop.f32.mrf.mxu3  ;;  %v1413_v42 = vadd.f32 %v1412_v10, %v1399_v29  ;;  %v3781_v10 = vld [vmem:[#allocation8 + $0x134] sm:$0xf0] }
  0xef   :  { %v3377_v39 = vor.u32 %v3787_v35, %v3376_v23  ;;  %v1400_v32 = vpop.f32.mrf.mxu2 }
  0xf0   :  { %v4153_v17 = vpack.c.bf16 %v1645_v8, %v1641_v7  ;;  %v1401_v50 = vadd.f32 %v1400_v32, %v338_v18  ;;  %v3285_v7 = vor.u32 %v3762_v61, %v3282_v62  ;;  %v3213_v18 = vor.u32 %v3744_v2, %v3210_v5  ;;  %v3777_v32 = vld [vmem:[#allocation8 + $0x114] sm:$0xf0]  ;;  %v3782_v62 = vld [vmem:[#allocation8 + $0x144] sm:$0xf]  ;;  %v3424_v5 = vld [vmem:[#allocation8 + $0x1c0] sm:$0xf] }
  0xf1   :  { %2072 = vmatpush.bf16.msra.mxu2 %v3377_v39  ;;  %v3336_v39 = vld [vmem:[#allocation8 + $0x110] sm:$0xf] }
  0xf2   :  { %2047 = vmatpush.bf16.msra.mxu0 %v3225_v37  ;;  %2061 = vmatpush.bf16.msra.mxu1 %v3289_v43  ;;  %v3785_v37 = vld [vmem:[#allocation8 + $0x154] sm:$0xf0]  ;;  %v1415_v60 = vadd.f32 %v1414_v38, %v1401_v50  ;;  %v3448_v50 = vld [vmem:[#allocation8 + $0x1f0] sm:$0xf] }
  0xf3   :  { %v3369_v45 = vor.u32 %v3785_v37, %v3368_v36  ;;  %v3337_v36 = vor.u32 %v3777_v32, %v3336_v39  ;;  %v3330_v39 = vld [vmem:[#allocation8 + $0x108] sm:$0xf0] }
  0xf5   :  { %2073 = vmatpush.bf16.msra.mxu2 %v3369_v45  ;;  %v3386_v45 = vld [vmem:[#allocation8 + $0x178] sm:$0xf0] }
  0xf6   :  { %2048 = vmatpush.bf16.msra.mxu0 %v3217_v47  ;;  %2062 = vmatpush.bf16.msra.mxu1 %v3281_v52  ;;  %v3748_v47 = vld [vmem:[#allocation8 + $0x34] sm:$0xf]  ;;  %v3290_v52 = vld [vmem:[#allocation8 + $0xb8] sm:$0xf0] }
  0xf7   :  { %v3229_v54 = vor.u32 %v3748_v47, %v3226_v48  ;;  %v3293_v59 = vor.u32 %v3764_v51, %v3290_v52  ;;  %v3786_v47 = vld [vmem:[#allocation8 + $0x164] sm:$0xf]  ;;  %v3378_v48 = vld [vmem:[#allocation8 + $0x168] sm:$0xf0]  ;;  %v3805_v51 = vld [vmem:[#allocation8 + $0x1f4] sm:$0xf0] }
  0xf8   :  { %v3449_v52 = vor.u32 %v3805_v51, %v3448_v50 }
  0xfa   :  { %2049 = vmatpush.bf16.msra.mxu0 %v3209_v58  ;;  %2063 = vmatpush.bf16.msra.mxu1 %v3273_v57  ;;  %v3218_v58 = vld [vmem:[#allocation8 + $0x28] sm:$0xf0] }
  0xfb   :  { %v3221_v6 = vor.u32 %v3746_v55, %v3218_v58  ;;  %2085 = vmatpush.bf16.msra.mxu3 %v3449_v52  ;;  %v3440_v55 = vld [vmem:[#allocation8 + $0x1e0] sm:$0xf]  ;;  %v3803_v58 = vld [vmem:[#allocation8 + $0x1e4] sm:$0xf0] }
  0xfe   :  { %2050 = vmatpush.bf16.msra.mxu0 %v3201_v4  ;;  %2064 = vmatpush.bf16.msra.mxu1 %v3265_v11  ;;  %v1426_v43 = vpop.f32.mrf.mxu0  ;;  %v1440_v46 = vpop.f32.mrf.mxu1  ;;  %v3783_v4 = vld [vmem:[#allocation8 + $0x144] sm:$0xf0] }
  0xff   :  { %v1427_v53 = vadd.f32 %v1426_v43, %v1413_v42  ;;  %v3361_v8 = vor.u32 %v3783_v4, %v3360_v3  ;;  %v3775_v42 = vld [vmem:[#allocation8 + $0x104] sm:$0xf0]  ;;  %v3780_v3 = vld [vmem:[#allocation8 + $0x134] sm:$0xf]  ;;  %v3354_v4 = vld [vmem:[#allocation8 + $0x138] sm:$0xf0] }
 0x100   :  { %v3329_v43 = vor.u32 %v3775_v42, %v3328_v41 }
 0x101   :  { %2051 = vmatmul.bf16.vlgmr.msra.gmra.mxu0 %v4153_v17  ;;  %v1441_v57 = vadd.f32 %v1440_v46, %v1427_v53  ;;  %2074 = vmatpush.bf16.msra.mxu2 %v3361_v8  ;;  %v3784_v53 = vld [vmem:[#allocation8 + $0x154] sm:$0xf]  ;;  %v3799_v8 = vld [vmem:[#allocation8 + $0x1c4] sm:$0xf0] }
 0x102   :  { %2099 = vmatpush.bf16.msrb.mxu0 %v3261_v9  ;;  %2113 = vmatpush.bf16.msrb.mxu1 %v3325_v14  ;;  %v3352_v9 = vld [vmem:[#allocation8 + $0x130] sm:$0xf]  ;;  %v3425_v12 = vor.u32 %v3799_v8, %v3424_v5  ;;  %v3418_v8 = vld [vmem:[#allocation8 + $0x1b8] sm:$0xf0] }
 0x103   :  { %v3353_v15 = vor.u32 %v3781_v10, %v3352_v9  ;;  %v3778_v9 = vld [vmem:[#allocation8 + $0x124] sm:$0xf]  ;;  %v3346_v10 = vld [vmem:[#allocation8 + $0x128] sm:$0xf0] }
 0x105   :  { %2075 = vmatpush.bf16.msra.mxu2 %v3353_v15 }
 0x106   :  { %2100 = vmatpush.bf16.msrb.mxu0 %v3253_v19  ;;  %2114 = vmatpush.bf16.msrb.mxu1 %v3317_v22  ;;  %v1428_v0 = vpop.f32.mrf.mxu0  ;;  %v1468_v1 = vpop.f32.mrf.mxu3  ;;  %v3344_v19 = vld [vmem:[#allocation8 + $0x120] sm:$0xf]  ;;  %v3202_v22 = vld [vmem:[#allocation8 + $0x8] sm:$0xf0] }
 0x107   :  { %v1454_v63 = vpop.f32.mrf.mxu2  ;;  %v1429_v11 = vadd.f32 %v1428_v0, %v1415_v60  ;;  %v1442_v14 = vpop.f32.mrf.mxu1  ;;  %v3345_v23 = vor.u32 %v3779_v20, %v3344_v19  ;;  %v3205_v31 = vor.u32 %v3742_v21, %v3202_v22  ;;  %v3441_v60 = vor.u32 %v3803_v58, %v3440_v55  ;;  %v3338_v19 = vld [vmem:[#allocation8 + $0x118] sm:$0xf0] }
 0x108   :  { %v1455_v16 = vadd.f32 %v1454_v63, %v1441_v57  ;;  %v3362_v63 = vld [vmem:[#allocation8 + $0x148] sm:$0xf0]  ;;  %v339_v0 = vperm.slane %v4145_v56, 2 }
 0x109   :  { %v1443_v25 = vadd.f32 %v1442_v14, %v1429_v11  ;;  %2076 = vmatpush.bf16.msra.mxu2 %v3345_v23  ;;  %2086 = vmatpush.bf16.msra.mxu3 %v3441_v60  ;;  %v3365_v57 = vor.u32 %v3782_v62, %v3362_v63  ;;  %v3797_v14 = vld [vmem:[#allocation8 + $0x1b4] sm:$0xf0]  ;;  %v3800_v62 = vld [vmem:[#allocation8 + $0x1d4] sm:$0xf]  ;;  %v3434_v63 = vld [vmem:[#allocation8 + $0x1d8] sm:$0xf0] }
 0x10a   :  { %2101 = vmatpush.bf16.msrb.mxu0 %v3245_v30  ;;  %2115 = vmatpush.bf16.msrb.mxu1 %v3309_v34  ;;  %v1469_v35 = vadd.f32 %v1468_v1, %v1455_v16  ;;  %v3432_v1 = vld [vmem:[#allocation8 + $0x1d0] sm:$0xf]  ;;  %v3349_v16 = vor.u32 %v3778_v9, %v3346_v10  ;;  %v3417_v21 = vor.u32 %v3797_v14, %v3416_v13  ;;  %v3794_v10 = vld [vmem:[#allocation8 + $0x1a4] sm:$0xf]  ;;  %v340_v13 = vperm.slane %v4145_v56, 3 }
 0x10c   :  { %v1642_v37 = vmax.f32 %v1469_v35, 0.0 }
 0x10d   :  { %2077 = vmatpush.bf16.msra.mxu2 %v3337_v36  ;;  %v3400_v36 = vld [vmem:[#allocation8 + $0x190] sm:$0xf] }
 0x10e   :  { %2102 = vmatpush.bf16.msrb.mxu0 %v3237_v44  ;;  %2116 = vmatpush.bf16.msrb.mxu1 %v3301_v49  ;;  %v1470_v30 = vpop.f32.mrf.mxu3  ;;  %v3788_v44 = vld [vmem:[#allocation8 + $0x174] sm:$0xf]  ;;  %v3381_v49 = vor.u32 %v3786_v47, %v3378_v48 }
 0x10f   :  { %v1456_v28 = vpop.f32.mrf.mxu2  ;;  %v3389_v46 = vor.u32 %v3788_v44, %v3386_v45  ;;  %v3392_v45 = vld [vmem:[#allocation8 + $0x180] sm:$0xf]  ;;  %v3804_v48 = vld [vmem:[#allocation8 + $0x1f4] sm:$0xf] }
 0x110   :  { %v1457_v29 = vadd.f32 %v1456_v28, %v1443_v25  ;;  %v3408_v25 = vld [vmem:[#allocation8 + $0x1a0] sm:$0xf] }
 0x111   :  { %2078 = vmatpush.bf16.msra.mxu2 %v3329_v43  ;;  %v3409_v35 = vor.u32 %v3795_v26, %v3408_v25 }
 0x112   :  { %2103 = vmatpush.bf16.msrb.mxu0 %v3229_v54  ;;  %2117 = vmatpush.bf16.msrb.mxu1 %v3293_v59  ;;  %v1471_v34 = vadd.f32 %v1470_v30, %v1457_v29  ;;  %v3370_v54 = vld [vmem:[#allocation8 + $0x158] sm:$0xf0] }
 0x114   :  { %v1646_v38 = vmax.f32 %v1471_v34, 0.0 }
 0x115   :  { %2127 = vmatpush.bf16.msrb.mxu2 %v3389_v46  ;;  %v3791_v46 = vld [vmem:[#allocation8 + $0x184] sm:$0xf0] }
 0x116   :  { %2104 = vmatpush.bf16.msrb.mxu0 %v3221_v6  ;;  %2118 = vmatpush.bf16.msrb.mxu1 %v3285_v7  ;;  %v1650_v40 = vpack.c.bf16 %v1646_v38, %v1642_v37  ;;  %v3801_v6 = vld [vmem:[#allocation8 + $0x1d4] sm:$0xf0]  ;;  %v3357_v7 = vor.u32 %v3780_v3, %v3354_v4  ;;  %v3393_v47 = vor.u32 %v3791_v46, %v3392_v45  ;;  %v3812_v46 = vld [vmem:[#allocation10 + $0x30] sm:$0xff] }
 0x117   :  { %v3433_v2 = vor.u32 %v3801_v6, %v3432_v1  ;;  %v3793_v37 = vld [vmem:[#allocation8 + $0x194] sm:$0xf0]  ;;  %v3798_v6 = vld [vmem:[#allocation8 + $0x1c4] sm:$0xf] }
 0x118   :  { %2065 = vmatmul.bf16.vlgmr.msra.gmra.mxu1 %v1650_v40  ;;  %v3813_v45 = vld [vmem:[#allocation10 + $0x38] sm:$0xff] }
 0x119   :  { %2128 = vmatpush.bf16.msrb.mxu2 %v3381_v49  ;;  %2087 = vmatpush.bf16.msra.mxu3 %v3433_v2  ;;  %v3450_v49 = vld [vmem:[#allocation8 + $0x1f8] sm:$0xf0]  ;;  %v3426_v2 = vld [vmem:[#allocation8 + $0x1c8] sm:$0xf0] }
 0x11a   :  { %2105 = vmatpush.bf16.msrb.mxu0 %v3213_v18  ;;  %2119 = vmatpush.bf16.msrb.mxu1 %v3277_v24  ;;  %v3776_v18 = vld [vmem:[#allocation8 + $0x114] sm:$0xf]  ;;  %v3453_v51 = vor.u32 %v3804_v48, %v3450_v49  ;;  %v3429_v3 = vor.u32 %v3798_v6, %v3426_v2  ;;  %v3810_v48 = vld [vmem:[#allocation10 + $0x20] sm:$0xff]  ;;  %v3809_v49 = vld [vmem:[#allocation10 + $0x18] sm:$0xff] }
 0x11b   :  { %v3341_v28 = vor.u32 %v3776_v18, %v3338_v19  ;;  %v3790_v18 = vld [vmem:[#allocation8 + $0x184] sm:$0xf] }
 0x11d   :  { %2088 = vmatpush.bf16.msra.mxu3 %v3425_v12 }
 0x11e   :  { %2106 = vmatpush.bf16.msrb.mxu0 %v3205_v31  ;;  %2120 = vmatpush.bf16.msrb.mxu1 %v3269_v33  ;;  %v1482_v59 = vpop.f32.mrf.mxu0  ;;  %v1496_v61 = vpop.f32.mrf.mxu1  ;;  %v3774_v31 = vld [vmem:[#allocation8 + $0x104] sm:$0xf] }
 0x11f   :  { %v1483_v11 = vadd.f32 %v1482_v59, %v339_v0  ;;  %v3333_v33 = vor.u32 %v3774_v31, %v3330_v39 }
 0x121   :  { %2107 = vmatmul.bf16.vlgmr.msrb.gmra.mxu0 %v4153_v17  ;;  %v3373_v17 = vor.u32 %v3784_v53, %v3370_v54  ;;  %v1497_v22 = vadd.f32 %v1496_v61, %v1483_v11  ;;  %2089 = vmatpush.bf16.msra.mxu3 %v3417_v21  ;;  %v3802_v54 = vld [vmem:[#allocation8 + $0x1e4] sm:$0xf]  ;;  %v3410_v11 = vld [vmem:[#allocation8 + $0x1a8] sm:$0xf0] }
 0x122   :  { %v3413_v12 = vor.u32 %v3794_v10, %v3410_v11  ;;  %2293 = vmatpush.bf16.msra.mxu0 %v3813_v45  ;;  %v3822_v45 = vld [vmem:[#allocation11] sm:$0xff] }
 0x123   :  { %2129 = vmatpush.bf16.msrb.mxu2 %v3373_v17  ;;  %v3442_v17 = vld [vmem:[#allocation8 + $0x1e8] sm:$0xf0] }
 0x124   :  { %v3445_v59 = vor.u32 %v3802_v54, %v3442_v17  ;;  %v3819_v54 = vld [vmem:[#allocation10 + $0x68] sm:$0xff]  ;;  %v3806_v17 = vld [vmem:[#allocation10] sm:$0xff] }
 0x125   :  { %2090 = vmatpush.bf16.msra.mxu3 %v3409_v35 }
 0x126   :  { %v1484_v20 = vpop.f32.mrf.mxu0  ;;  %v1498_v24 = vpop.f32.mrf.mxu1  ;;  %2294 = vmatpush.bf16.msra.mxu0 %v3812_v46 }
 0x127   :  { %2130 = vmatpush.bf16.msrb.mxu2 %v3365_v57  ;;  %v1510_v15 = vpop.f32.mrf.mxu2  ;;  %v1524_v27 = vpop.f32.mrf.mxu3  ;;  %v1485_v23 = vadd.f32 %v1484_v20, %v339_v0  ;;  %v3437_v0 = vor.u32 %v3800_v62, %v3434_v63  ;;  %v3815_v63 = vld [vmem:[#allocation10 + $0x48] sm:$0xff] }
 0x128   :  { %2121 = vmatmul.bf16.vlgmr.msrb.gmra.mxu1 %v1650_v40  ;;  %v1511_v29 = vadd.f32 %v1510_v15, %v1497_v22  ;;  %v3401_v40 = vor.u32 %v3793_v37, %v3400_v36  ;;  %v3792_v15 = vld [vmem:[#allocation8 + $0x194] sm:$0xf] }
 0x129   :  { %v1499_v30 = vadd.f32 %v1498_v24, %v1485_v23  ;;  %v3394_v24 = vld [vmem:[#allocation8 + $0x188] sm:$0xf0] }
 0x12a   :  { %v1525_v34 = vadd.f32 %v1524_v27, %v1511_v29  ;;  %2091 = vmatpush.bf16.msra.mxu3 %v3401_v40  ;;  %v3397_v25 = vor.u32 %v3790_v18, %v3394_v24 }
 0x12b   :  { %2131 = vmatpush.bf16.msrb.mxu2 %v3357_v7  ;;  %v3796_v7 = vld [vmem:[#allocation8 + $0x1b4] sm:$0xf] }
 0x12c   :  { %v3421_v9 = vor.u32 %v3796_v7, %v3418_v8 }
 0x12e   :  { %2092 = vmatpush.bf16.msra.mxu3 %v3393_v47  ;;  %v3811_v47 = vld [vmem:[#allocation10 + $0x28] sm:$0xff] }
 0x12f   :  { %2132 = vmatpush.bf16.msrb.mxu2 %v3349_v16  ;;  %v1512_v32 = vpop.f32.mrf.mxu2  ;;  %v1526_v43 = vpop.f32.mrf.mxu3  ;;  %v3402_v16 = vld [vmem:[#allocation8 + $0x198] sm:$0xf0]  ;;  %2295 = vmatpush.bf16.msra.mxu0 %v3811_v47 }
 0x130   :  { %v1513_v42 = vadd.f32 %v1512_v32, %v1499_v30  ;;  %v3405_v22 = vor.u32 %v3792_v15, %v3402_v16 }
 0x132   :  { %v1527_v50 = vadd.f32 %v1526_v43, %v1513_v42  ;;  %2141 = vmatpush.bf16.msrb.mxu3 %v3453_v51  ;;  %v3808_v51 = vld [vmem:[#allocation10 + $0x10] sm:$0xff] }
 0x133   :  { %2133 = vmatpush.bf16.msrb.mxu2 %v3341_v28  ;;  %2296 = vmatpush.bf16.msra.mxu0 %v3810_v48  ;;  %v3845_v48 = vld [vmem:[%s4181_s6] ss:$0 sm:$0xff] }
 0x136   :  { %2142 = vmatpush.bf16.msrb.mxu3 %v3445_v59  ;;  %v3816_v59 = vld [vmem:[#allocation10 + $0x50] sm:$0xff] }
 0x137   :  { %2134 = vmatpush.bf16.msrb.mxu2 %v3333_v33  ;;  %2297 = vmatpush.bf16.msra.mxu0 %v3809_v49 }
 0x13a   :  { %2143 = vmatpush.bf16.msrb.mxu3 %v3437_v0  ;;  %v3814_v0 = vld [vmem:[#allocation10 + $0x40] sm:$0xff] }
 0x13b   :  { %2298 = vmatpush.bf16.msra.mxu0 %v3808_v51 }
 0x13e   :  { %v1538_v38 = vpop.f32.mrf.mxu0  ;;  %v1552_v41 = vpop.f32.mrf.mxu1  ;;  %2144 = vmatpush.bf16.msrb.mxu3 %v3429_v3 }
 0x13f   :  { %v1539_v44 = vadd.f32 %v1538_v38, %v1525_v34 }
 0x141   :  { %v1553_v52 = vadd.f32 %v1552_v41, %v1539_v44 }
 0x142   :  { %2145 = vmatpush.bf16.msrb.mxu3 %v3421_v9 }
 0x143   :  { %v1643_v60 = vmax.f32 %v1553_v52, 0.0  ;;  %v3820_v52 = vld [vmem:[#allocation10 + $0x70] sm:$0xff] }
 0x146   :  { %v1540_v53 = vpop.f32.mrf.mxu0  ;;  %v1554_v58 = vpop.f32.mrf.mxu1  ;;  %2146 = vmatpush.bf16.msrb.mxu3 %v3413_v12 }
 0x147   :  { %v1541_v55 = vadd.f32 %v1540_v53, %v1527_v50  ;;  %v1566_v4 = vpop.f32.mrf.mxu2  ;;  %v1580_v5 = vpop.f32.mrf.mxu3  ;;  %v3821_v50 = vld [vmem:[#allocation10 + $0x78] sm:$0xff]  ;;  %v3807_v53 = vld [vmem:[#allocation10 + $0x8] sm:$0xff] }
 0x148   :  { %v1567_v19 = vadd.f32 %v1566_v4, %v340_v13  ;;  %2307 = vmatpush.bf16.msra.mxu1 %v3821_v50  ;;  %2299 = vmatpush.bf16.msra.mxu0 %v3807_v53 }
 0x149   :  { %v1555_v61 = vadd.f32 %v1554_v58, %v1541_v55  ;;  %v3818_v55 = vld [vmem:[#allocation10 + $0x60] sm:$0xff]  ;;  %v3817_v58 = vld [vmem:[#allocation10 + $0x58] sm:$0xff] }
 0x14a   :  { %2147 = vmatpush.bf16.msrb.mxu3 %v3405_v22  ;;  %v1581_v27 = vadd.f32 %v1580_v5, %v1567_v19 }
 0x14b   :  { %v1647_v57 = vmax.f32 %v1555_v61, 0.0 }
 0x14c   :  { %2308 = vmatpush.bf16.msra.mxu1 %v3820_v52  ;;  %2300 = vmatpush.bf16.msra.mxu0 %v3806_v17 }
 0x14d   :  { %v1651_v1 = vpack.c.bf16 %v1647_v57, %v1643_v60  ;;  %v1717_v57 = vld [vmem:[%s4179_s4] sm:$0x3] }
 0x14e   :  { %2148 = vmatpush.bf16.msrb.mxu3 %v3397_v25 }
 0x14f   :  { %2079 = vmatmul.bf16.vlgmr.msra.gmra.mxu2 %v1651_v1  ;;  %v1568_v14 = vpop.f32.mrf.mxu2  ;;  %v1582_v20 = vpop.f32.mrf.mxu3 }
 0x150   :  { %v1569_v28 = vadd.f32 %v1568_v14, %v340_v13  ;;  %2309 = vmatpush.bf16.msra.mxu1 %v3819_v54 }
 0x152   :  { %v1583_v56 = vadd.f32 %v1582_v20, %v1569_v28 }
 0x154   :  { %2310 = vmatpush.bf16.msra.mxu1 %v3818_v55 }
 0x158   :  { %2311 = vmatpush.bf16.msra.mxu1 %v3817_v58 }
 0x15c   :  { %2312 = vmatpush.bf16.msra.mxu1 %v3816_v59  ;;  %v3846_v59 = vld [vmem:[%s4183_s8] ss:$0 sm:$0xff] }
 0x15e   :  { %v1594_v21 = vpop.f32.mrf.mxu0  ;;  %v1608_v26 = vpop.f32.mrf.mxu1 }
 0x15f   :  { %2135 = vmatmul.bf16.vlgmr.msrb.gmra.mxu2 %v1651_v1  ;;  %v1595_v23 = vadd.f32 %v1594_v21, %v1581_v27  ;;  %v1719_v1 = vperm.slane %v1717_v57, 0  ;;  %v1720_v21 = vperm.slane %v1717_v57, 1 }
 0x160   :  { %2313 = vmatpush.bf16.msra.mxu1 %v3815_v63 }
 0x161   :  { %v1609_v31 = vadd.f32 %v1608_v26, %v1595_v23 }
 0x164   :  { %2314 = vmatpush.bf16.msra.mxu1 %v3814_v0 }
 0x166   :  { %v1622_v35 = vpop.f32.mrf.mxu2  ;;  %v1636_v29 = vpop.f32.mrf.mxu3 }
 0x167   :  { %v1596_v30 = vpop.f32.mrf.mxu0  ;;  %v1623_v32 = vadd.f32 %v1622_v35, %v1609_v31  ;;  %v1610_v33 = vpop.f32.mrf.mxu1 }
 0x168   :  { %v1597_v39 = vadd.f32 %v1596_v30, %v1583_v56 }
 0x169   :  { %v1637_v37 = vadd.f32 %v1636_v29, %v1623_v32 }
 0x16a   :  { %v1611_v34 = vadd.f32 %v1610_v33, %v1597_v39 }
 0x16b   :  { %v1644_v42 = vmax.f32 %v1637_v37, 0.0  ;;  %v3829_v37 = vld [vmem:[#allocation11 + $0x38] sm:$0xff] }
 0x16c   :  { %2392 = vmatpush.bf16.msra.mxu2 %v3829_v37 }
 0x16e   :  { %v1624_v36 = vpop.f32.mrf.mxu2  ;;  %v1638_v40 = vpop.f32.mrf.mxu3 }
 0x16f   :  { %v1625_v38 = vadd.f32 %v1624_v36, %v1611_v34 }
 0x171   :  { %v1639_v41 = vadd.f32 %v1638_v40, %v1625_v38  ;;  %v3828_v38 = vld [vmem:[#allocation11 + $0x30] sm:$0xff]  ;;  %v3827_v40 = vld [vmem:[#allocation11 + $0x28] sm:$0xff] }
 0x172   :  { %2393 = vmatpush.bf16.msra.mxu2 %v3828_v38 }
 0x173   :  { %v1648_v43 = vmax.f32 %v1639_v41, 0.0  ;;  %v3826_v41 = vld [vmem:[#allocation11 + $0x20] sm:$0xff] }
 0x175   :  { %v1652_v44 = vpack.c.bf16 %v1648_v43, %v1644_v42  ;;  %v3825_v42 = vld [vmem:[#allocation11 + $0x18] sm:$0xff]  ;;  %v3824_v43 = vld [vmem:[#allocation11 + $0x10] sm:$0xff] }
 0x176   :  { %2394 = vmatpush.bf16.msra.mxu2 %v3827_v40 }
 0x177   :  { %2093 = vmatmul.bf16.vlgmr.msra.gmra.mxu3 %v1652_v44 }
 0x17a   :  { %2395 = vmatpush.bf16.msra.mxu2 %v3826_v41 }
 0x17e   :  { %v2052_v60 = vpop.f32.mrf.mxu0  ;;  %2396 = vmatpush.bf16.msra.mxu2 %v3825_v42 }
 0x17f   :  { %v2053_v5 = vadd.f32 %v2052_v60, %v1719_v1 }
 0x182   :  { %2397 = vmatpush.bf16.msra.mxu2 %v3824_v43 }
 0x186   :  { %v2054_v6 = vpop.f32.mrf.mxu0 }
 0x187   :  { %2149 = vmatmul.bf16.vlgmr.msrb.gmra.mxu3 %v1652_v44  ;;  %v2055_v7 = vadd.f32 %v2054_v6, %v1719_v1  ;;  %v3823_v44 = vld [vmem:[#allocation11 + $0x8] sm:$0xff] }
 0x188   :  { %2398 = vmatpush.bf16.msra.mxu2 %v3823_v44 }
 0x18c   :  { %2399 = vmatpush.bf16.msra.mxu2 %v3822_v45 }
 0x195   :  { %v2066_v61 = vpop.f32.mrf.mxu1 }
 0x196   :  { %v2067_v8 = vadd.f32 %v2066_v61, %v2053_v5 }
 0x19d   :  { %v2068_v2 = vpop.f32.mrf.mxu1 }
 0x19e   :  { %v2069_v9 = vadd.f32 %v2068_v2, %v2055_v7  ;;  %v2108_v11 = vpop.f32.mrf.mxu0 }
 0x19f   :  { %v2109_v26 = vadd.f32 %v2108_v11, %v1720_v21 }
 0x1a5   :  { %v2122_v14 = vpop.f32.mrf.mxu1 }
 0x1a6   :  { %v2110_v24 = vpop.f32.mrf.mxu0  ;;  %v2123_v23 = vadd.f32 %v2122_v14, %v2109_v26 }
 0x1a7   :  { %v2111_v28 = vadd.f32 %v2110_v24, %v1720_v21 }
 0x1ad   :  { %v2124_v27 = vpop.f32.mrf.mxu1 }
 0x1ae   :  { %v2125_v56 = vadd.f32 %v2124_v27, %v2111_v28 }
 0x1d2   :  { %v2080_v62 = vpop.f32.mrf.mxu2 }
 0x1d3   :  { %v2081_v10 = vadd.f32 %v2080_v62, %v2067_v8 }
 0x1da   :  { %v2082_v3 = vpop.f32.mrf.mxu2 }
 0x1db   :  { %v2083_v12 = vadd.f32 %v2082_v3, %v2069_v9 }
 0x1e2   :  { %v2136_v18 = vpop.f32.mrf.mxu2 }
 0x1e3   :  { %v2137_v29 = vadd.f32 %v2136_v18, %v2123_v23 }
 0x1ea   :  { %v2138_v35 = vpop.f32.mrf.mxu2 }
 0x1eb   :  { %v2139_v30 = vadd.f32 %v2138_v35, %v2125_v56 }
 0x1fa   :  { %v2094_v4 = vpop.f32.mrf.mxu3 }
 0x1fb   :  { %v2095_v13 = vadd.f32 %v2094_v4, %v2081_v10 }
 0x1fd   :  { %v2155_v19 = vmax.f32 %v2095_v13, 0.0 }
 0x202   :  { %v2096_v15 = vpop.f32.mrf.mxu3 }
 0x203   :  { %v2097_v16 = vadd.f32 %v2096_v15, %v2083_v12 }
 0x205   :  { %v2157_v20 = vmax.f32 %v2097_v16, 0.0 }
 0x207   :  { %v2159_v22 = vpack.c.bf16 %v2157_v20, %v2155_v19 }
 0x209   :  { %2301 = vmatmul.bf16.vlgmr.msra.gmra.mxu0 %v2159_v22 }
 0x20a   :  { %v2150_v25 = vpop.f32.mrf.mxu3 }
 0x20b   :  { %v2151_v31 = vadd.f32 %v2150_v25, %v2137_v29 }
 0x20d   :  { %v2156_v33 = vmax.f32 %v2151_v31, 0.0 }
 0x212   :  { %v2152_v39 = vpop.f32.mrf.mxu3 }
 0x213   :  { %v2153_v32 = vadd.f32 %v2152_v39, %v2139_v30 }
 0x215   :  { %v2158_v34 = vmax.f32 %v2153_v32, 0.0 }
 0x217   :  { %v2160_v36 = vpack.c.bf16 %v2158_v34, %v2156_v33 }
 0x219   :  { %2315 = vmatmul.bf16.vlgmr.msra.gmra.mxu1 %v2160_v36 }
 0x286   :  { %v2302_v46 = vpop.f32.mrf.mxu0 }
 0x287   :  { %v2303_v50 = vadd.f32 %v3845_v48, %v2302_v46 }
 0x28e   :  { %v2304_v49 = vpop.f32.mrf.mxu0 }
 0x28f   :  { %v2305_v51 = vadd.f32 %v3845_v48, %v2304_v49 }
 0x296   :  { %v2316_v47 = vpop.f32.mrf.mxu1 }
 0x297   :  { %v2317_v52 = vadd.f32 %v2316_v47, %v2303_v50 }
 0x299   :  { %v2321_v17 = vmax.f32 %v2317_v52, 0.0 }
 0x29e   :  { %v2318_v53 = vpop.f32.mrf.mxu1 }
 0x29f   :  { %v2319_v54 = vadd.f32 %v2318_v53, %v2305_v51 }
 0x2a1   :  { %v2322_v55 = vmax.f32 %v2319_v54, 0.0 }
 0x2a3   :  { %v2323_v58 = vpack.c.bf16 %v2322_v55, %v2321_v17 }
 0x2a5   :  { %2400 = vmatmul.bf16.vlgmr.msra.gmra.mxu2 %v2323_v58 }
 0x328   :  { %v2401_v60 = vpop.f32.mrf.mxu2 }
 0x329   :  { %v2402_v61 = vadd.f32 %v3846_v59, %v2401_v60 }
 0x32b   :  { %2406 = vst [vmem:[#allocation13] sm:$0xff] %v2402_v61 }
 0x330   :  { %v2403_v62 = vpop.f32.mrf.mxu2 }
 0x331   :  { %v2404_v63 = vadd.f32 %v3846_v59, %v2403_v62 }
 0x333   :  { %2407 = vst [vmem:[#allocation13 + $0x8] sm:$0xff] %v2404_v63 }
 0x334   :  { %2420 = dma.vmem_to_hbm [thread:$0]  %s2413_s26, 256, %s2415_s28, [#allocation4], %s4029_s21, %s4029_s21, %s4030_s22  }
 0x335   :  { %4023 = dma.done.wait [#allocation4], 256  }
 0x336   :  { %4024 = vsyncadd [#allocation4], 4294967040 }
 0x337   :  { %2425 = vsyncpa [#allocation3], 1 }
 0x338   :  { %2426 = vsyncpa [#allocation6], 1 }
 0x339   :  { %2427 = vsyncpa [#allocation9], 1 }
 0x33a   :  { %2428 = vsyncpa [#allocation12], 1 }
 0x33b   :  { %2429 = vsyncpa [#allocation4], 1 }

</bundles_post_ra>
